<compile_context>
chip_gen: v6e
topology: v6e:2x2x1
jax: 0.10.0
libtpu: 0.0.40
codegen_flags: <defaults>
</compile_context>

<pallas_src>
import jax
import jax.numpy as jnp
from jax.experimental import pallas as pl
from jax.experimental.pallas import tpu as pltpu


def _round_up(x, m):
    return (x + m - 1) // m * m


def attn_kernel(hidden_ref, enc_ref, lens_ref, wh_ref, we_ref, bias_ref, v_ref, out_ref):
    # hidden_ref: (Bt, H)       decoder hidden state, bf16
    # enc_ref:    (Bt, Tp, E)   encoder outputs, batch-major, bf16 (T zero-padded)
    # lens_ref:   (Bt, 1)       valid sequence length per row, int32
    # wh_ref:     (H, Hp)       W[:, :H].T zero-padded on the output axis, bf16
    # we_ref:     (E, Hp)       W[:, H:].T zero-padded on the output axis, bf16
    # bias_ref:   (1, Hp)       Linear bias, zero-padded, f32
    # v_ref:      (1, Hp)       score vector v, zero-padded, f32
    # out_ref:    (Bt, Tp)      softmax attention weights (cols >= len are exactly 0)
    Bt, Tp, E = enc_ref.shape
    Hp = wh_ref.shape[1]

    # hidden projection + bias: (Bt, Hp) -- bf16 MXU operands (fed from the wrapper), f32 acc
    proj_h = jnp.dot(hidden_ref[...], wh_ref[...],
                     preferred_element_type=jnp.float32) + bias_ref[...]

    # encoder projection: (Bt*Tp, E) @ (E, Hp) -> (Bt, Tp, Hp), f32 accumulation
    proj_e = jnp.dot(enc_ref[...].reshape(Bt * Tp, E), we_ref[...],
                     preferred_element_type=jnp.float32).reshape(Bt, Tp, Hp)

    # energy = tanh(Linear(cat([hidden, enc], -1)))   (tanh on the EUP, f32)
    energy = jnp.tanh(proj_e + proj_h[:, None, :])                      # (Bt, Tp, Hp)

    # score = v . energy (zero-padded v => padded Hp lanes contribute 0)
    # TODO(synk): if profiling shows the XLU lane-reduce as the binding slot, move this
    #             contraction onto the MXU / restructure energy as (Bt, Hp, Tp).
    scores = jnp.sum(energy * v_ref[0, :], axis=-1)                     # (Bt, Tp)

    # mask positions >= the row's valid length (covers both src_len masking and T padding)
    col = jax.lax.broadcasted_iota(jnp.int32, (Bt, Tp), 1)
    scores = jnp.where(col < lens_ref[...], scores, -1e30)

    # numerically stable softmax over T in f32, EXACT divide so rows sum to 1
    m = jnp.max(scores, axis=-1, keepdims=True)
    e = jnp.exp(scores - m)
    out_ref[...] = (e / jnp.sum(e, axis=-1, keepdims=True)).astype(out_ref.dtype)


def prepare_params(params, hidden_size, input_size):
    """One-time weight prep: split/transpose the Linear weight, zero-pad only the projection
    OUTPUT width to a lane-dense multiple of 128, pre-cast MXU operands to bf16."""
    H, E = hidden_size, input_size
    Hp = _round_up(H, 128)
    W = params["attn_w"]                                              # (H, H+E) f32
    wh = jnp.zeros((H, Hp), jnp.bfloat16).at[:, :H].set(W[:, :H].T.astype(jnp.bfloat16))
    we = jnp.zeros((E, Hp), jnp.bfloat16).at[:, :H].set(W[:, H:].T.astype(jnp.bfloat16))
    bias = jnp.zeros((1, Hp), jnp.float32).at[0, :H].set(params["attn_b"])
    v = jnp.zeros((1, Hp), jnp.float32).at[0, :H].set(params["v"])
    return {"wh": wh, "we": we, "bias": bias, "v": v, "H": H, "E": E, "Hp": Hp}


def _tile_plan(B, T_pad, E, H, Hp, block_b_max, vmem_budget_bytes):
    """Pick the batch tile Bt from a VMEM budget (v7x: 64 MiB physical) and derive the
    scoped-VMEM limit from the estimated working set."""
    bytes_per_row = (
        2 * T_pad * E * 2          # encoder tile, bf16, double-buffered
        + 2 * T_pad * 4            # output tile, f32, double-buffered
        + 2 * T_pad * Hp * 4       # proj_e + energy f32 intermediates
        + 2 * H * 2 + 2 * 4        # hidden tile (bf16) + lens tile (i32), double-buffered
    )
    bt = (vmem_budget_bytes // bytes_per_row) // 8 * 8
    bt = max(8, min(block_b_max, bt, _round_up(B, 8)))
    if B > 8:
        # at least 2 grid steps: enables megacore sharding (v7x) and DMA/compute overlap
        bt = min(bt, _round_up(pl.cdiv(B, 2), 8))
    resident = 2 * ((H + E) * Hp * 2 + 2 * Hp * 4)        # weights/bias/v (double-buffered)
    est = bt * bytes_per_row + resident + (4 << 20)
    vmem_limit = int(min(96 << 20, max(32 << 20, est)))   # <=64 MiB-safe on v7x by budget
    return bt, vmem_limit


def attn_forward(prepared, hidden, encoder_outputs, src_len=None, *,
                 block_b_max=64, vmem_budget_bytes=32 << 20):
    """Forward pass of Attn. Returns attention weights of shape (B, 1, T).

    hidden:           (1, B, H) float32
    encoder_outputs:  (T, B, E) float32
    src_len:          optional (B,) int lengths for masking
    """
    T, B, E = encoder_outputs.shape
    H, Hp = prepared["H"], prepared["Hp"]
    assert hidden.shape == (1, B, H) and E == prepared["E"]

    T_pad = _round_up(T, 128)                       # lane-dense scores / output width
    Bt, vmem_limit = _tile_plan(B, T_pad, E, H, Hp, block_b_max, vmem_budget_bytes)
    B_pad = _round_up(B, Bt)

    # Layout plumbing, emitted directly in bf16 (no intermediate padded f32 HBM copy, E
    # kept at its true width). The (T,B,E)->(B,T,E) transpose disappears if the producer
    # emits batch-major encoder outputs.
    # TODO(synk): for very small T the 128-pad of the enc input over-fetches; could pad the
    #             input T only to a multiple of 16 and widen the scores in-kernel.
    enc_p = jnp.pad(jnp.transpose(encoder_outputs, (1, 0, 2)).astype(jnp.bfloat16),
                    ((0, B_pad - B), (0, T_pad - T), (0, 0)))           # (B_pad, T_pad, E)
    hid_p = jnp.pad(hidden[0].astype(jnp.bfloat16), ((0, B_pad - B), (0, 0)))  # (B_pad, H)

    if src_len is None:
        lens = jnp.full((B,), T, dtype=jnp.int32)
    else:
        lens = jnp.asarray(src_len, dtype=jnp.int32)
    lens_p = jnp.full((B_pad, 1), T, dtype=jnp.int32).at[:B, 0].set(lens)

    grid = (B_pad // Bt,)
    out = pl.pallas_call(
        attn_kernel,
        out_shape=jax.ShapeDtypeStruct((B_pad, T_pad), jnp.float32),
        grid_spec=pltpu.PrefetchScalarGridSpec(
            num_scalar_prefetch=0,
            grid=grid,
            in_specs=[
                pl.BlockSpec((Bt, H), lambda i: (i, 0)),            # hidden tile
                pl.BlockSpec((Bt, T_pad, E), lambda i: (i, 0, 0)),  # encoder tile (pipelined)
                pl.BlockSpec((Bt, 1), lambda i: (i, 0)),            # per-row valid length
                pl.BlockSpec((H, Hp), lambda i: (0, 0)),            # W_h^T  (resident)
                pl.BlockSpec((E, Hp), lambda i: (0, 0)),            # W_e^T  (resident)
                pl.BlockSpec((1, Hp), lambda i: (0, 0)),            # bias   (resident)
                pl.BlockSpec((1, Hp), lambda i: (0, 0)),            # v      (resident)
            ],
            out_specs=pl.BlockSpec((Bt, T_pad), lambda i: (i, 0)),
        ),
        compiler_params=pltpu.CompilerParams(
            dimension_semantics=("parallel",),        # megacore sharding when grid > 1
            vmem_limit_bytes=vmem_limit,
        ),
    )(hid_p, enc_p, lens_p, prepared["wh"], prepared["we"], prepared["bias"], prepared["v"])

    return out[:B, None, :T]                                            # (B, 1, T)


def attn_reference(params, hidden, encoder_outputs, src_len=None):
    """Pure-JAX f32 reference matching the PyTorch module."""
    T, B, E = encoder_outputs.shape
    H = hidden.shape[-1]
    W, b, v = params["attn_w"], params["attn_b"], params["v"]
    h = hidden[0]                                                       # (B, H)
    enc = jnp.transpose(encoder_outputs, (1, 0, 2))                     # (B, T, E)
    cat = jnp.concatenate([jnp.broadcast_to(h[:, None, :], (B, T, H)), enc], axis=-1)
    energy = jnp.tanh(cat @ W.T + b)                                    # (B, T, H)
    scores = jnp.einsum("bth,h->bt", energy, v)                         # (B, T)
    if src_len is not None:
        col = jnp.arange(T)[None, :]
        scores = jnp.where(col < jnp.asarray(src_len)[:, None], scores, -1e18)
    return jax.nn.softmax(scores, axis=-1)[:, None, :]                  # (B, 1, T)


def init_params(key, hidden_size, input_size):
    """Deterministic parameter init matching nn.Linear defaults + the custom v init."""
    k_w, k_b, k_v = jax.random.split(key, 3)
    fan_in = hidden_size + input_size
    bound = 1.0 / jnp.sqrt(fan_in)
    attn_w = jax.random.uniform(k_w, (hidden_size, fan_in),
                                minval=-bound, maxval=bound, dtype=jnp.float32)
    attn_b = jax.random.uniform(k_b, (hidden_size,),
                                minval=-bound, maxval=bound, dtype=jnp.float32)
    stdv = 1.0 / jnp.sqrt(hidden_size)
    v = stdv * jax.random.normal(k_v, (hidden_size,), dtype=jnp.float32)
    return {"attn_w": attn_w, "attn_b": attn_b, "v": v}


if __name__ == "__main__":
    B, T = 2, 8               # batch, source sequence length
    H, E = 32, 16             # hidden_size, input_size (encoder output dim)

    key = jax.random.PRNGKey(0)
    k_p, k_h, k_e = jax.random.split(key, 3)

    params = init_params(k_p, H, E)
    prepared = prepare_params(params, H, E)          # one-time weight prep (not per step)

    hidden = jax.random.normal(k_h, (1, B, H), dtype=jnp.float32)           # (1, B, H)
    encoder_outputs = jax.random.normal(k_e, (T, B, E), dtype=jnp.float32)  # (T, B, E)

    # --- src_len=None path ---
    attn_weights = jax.block_until_ready(attn_forward(prepared, hidden, encoder_outputs))
    ref = attn_reference(params, hidden, encoder_outputs)
    assert attn_weights.shape == (B, 1, T)
    assert bool(jnp.allclose(jnp.sum(attn_weights, axis=-1), 1.0, atol=1e-3))  # exact divide
    assert bool(jnp.allclose(attn_weights, ref, atol=5e-2))  # bf16 MXU operands vs f32 ref

    # --- src_len masking path ---
    src_len = jnp.array([5, 8], dtype=jnp.int32)
    attn_weights_m = jax.block_until_ready(
        attn_forward(prepared, hidden, encoder_outputs, src_len))
    ref_m = attn_reference(params, hidden, encoder_outputs, src_len)
    assert bool(jnp.allclose(jnp.sum(attn_weights_m, axis=-1), 1.0, atol=1e-3))
    assert bool(jnp.allclose(attn_weights_m, ref_m, atol=5e-2))
    assert bool(jnp.all(attn_weights_m[0, 0, 5:] < 1e-6))   # masked positions get 0 weight

    print("KERNEL_OK")
</pallas_src>

<mosaic_0001>
module attributes {stable_mosaic.version = 11 : i64} {
  func.func @attn_kernel(%arg0: i32, %arg1: memref<8x32xbf16, #tpu.memory_space<vmem>>, %arg2: memref<8x128x16xbf16, #tpu.memory_space<vmem>>, %arg3: memref<8x1xi32, #tpu.memory_space<vmem>>, %arg4: memref<32x128xbf16, #tpu.memory_space<vmem>>, %arg5: memref<16x128xbf16, #tpu.memory_space<vmem>>, %arg6: memref<1x128xf32, #tpu.memory_space<vmem>>, %arg7: memref<1x128xf32, #tpu.memory_space<vmem>>, %arg8: memref<8x128xf32, #tpu.memory_space<vmem>>) attributes {dimension_semantics = [#tpu.dimension_semantics<parallel>], iteration_bounds = array<i64: 1>, scalar_prefetch = 0 : i64, scratch_operands = 0 : i64, tpu.core_type = #tpu.core_type<tc>, window_params = [{transform_indices = @transform_0, window_bounds = array<i64: 8, 32>}, {transform_indices = @transform_1, window_bounds = array<i64: 8, 128, 16>}, {transform_indices = @transform_2, window_bounds = array<i64: 8, 1>}, {pipeline_mode = #tpu.pipeline_mode<synchronous>, transform_indices = @transform_3, window_bounds = array<i64: 32, 128>}, {pipeline_mode = #tpu.pipeline_mode<synchronous>, transform_indices = @transform_4, window_bounds = array<i64: 16, 128>}, {pipeline_mode = #tpu.pipeline_mode<synchronous>, transform_indices = @transform_5, window_bounds = array<i64: 1, 128>}, {pipeline_mode = #tpu.pipeline_mode<synchronous>, transform_indices = @transform_6, window_bounds = array<i64: 1, 128>}, {transform_indices = @transform_7, window_bounds = array<i64: 8, 128>}]} {
    %c0 = arith.constant 0 : index
    %c0_0 = arith.constant 0 : index
    %0 = vector.load %arg1[%c0, %c0_0] : memref<8x32xbf16, #tpu.memory_space<vmem>>, vector<8x32xbf16>
    %c0_1 = arith.constant 0 : index
    %c0_2 = arith.constant 0 : index
    %1 = vector.load %arg4[%c0_1, %c0_2] : memref<32x128xbf16, #tpu.memory_space<vmem>>, vector<32x128xbf16>
    %cst = arith.constant dense<0.000000e+00> : vector<8x128xf32>
    %2 = tpu.matmul %0, %1, %cst {dimension_numbers = #tpu.dot_dimension_numbers<[1], [0], [0], [1], [0, 0, 1, 1], [], []>} : vector<8x32xbf16>, vector<32x128xbf16>, vector<8x128xf32> -> vector<8x128xf32>
    %c0_3 = arith.constant 0 : index
    %c0_4 = arith.constant 0 : index
    %3 = vector.load %arg6[%c0_3, %c0_4] : memref<1x128xf32, #tpu.memory_space<vmem>>, vector<1x128xf32>
    %4 = vector.broadcast %3 : vector<1x128xf32> to vector<8x128xf32>
    %5 = arith.addf %2, %4 : vector<8x128xf32>
    %c0_5 = arith.constant 0 : index
    %c0_6 = arith.constant 0 : index
    %c0_7 = arith.constant 0 : index
    %6 = vector.load %arg2[%c0_5, %c0_6, %c0_7] : memref<8x128x16xbf16, #tpu.memory_space<vmem>>, vector<8x128x16xbf16>
    %7 = vector.shape_cast %6 : vector<8x128x16xbf16> to vector<1024x16xbf16>
    %c0_8 = arith.constant 0 : index
    %c0_9 = arith.constant 0 : index
    %8 = vector.load %arg5[%c0_8, %c0_9] : memref<16x128xbf16, #tpu.memory_space<vmem>>, vector<16x128xbf16>
    %cst_10 = arith.constant dense<0.000000e+00> : vector<1024x128xf32>
    %9 = tpu.matmul %7, %8, %cst_10 {dimension_numbers = #tpu.dot_dimension_numbers<[1], [0], [0], [1], [0, 0, 1, 1], [], []>} : vector<1024x16xbf16>, vector<16x128xbf16>, vector<1024x128xf32> -> vector<1024x128xf32>
    %10 = vector.shape_cast %9 : vector<1024x128xf32> to vector<8x128x128xf32>
    %11 = vector.shape_cast %5 : vector<8x128xf32> to vector<8x1x128xf32>
    %12 = vector.broadcast %11 : vector<8x1x128xf32> to vector<8x128x128xf32>
    %13 = arith.addf %10, %12 : vector<8x128x128xf32>
    %14 = math.tanh %13 : vector<8x128x128xf32>
    %c0_11 = arith.constant 0 : index
    %c0_12 = arith.constant 0 : index
    %15 = vector.load %arg7[%c0_11, %c0_12] : memref<1x128xf32, #tpu.memory_space<vmem>>, vector<1x128xf32>
    %16 = vector.shape_cast %15 : vector<1x128xf32> to vector<128xf32>
    %17 = vector.shape_cast %16 : vector<128xf32> to vector<1x1x128xf32>
    %18 = vector.broadcast %17 : vector<1x1x128xf32> to vector<8x128x128xf32>
    %19 = arith.mulf %14, %18 : vector<8x128x128xf32>
    %cst_13 = arith.constant dense<0.000000e+00> : vector<8x128xf32>
    %20 = vector.multi_reduction <add>, %19, %cst_13 [2] : vector<8x128x128xf32> to vector<8x128xf32>
    %21 = tpu.iota {dimensions = array<i32: 1>} : vector<8x128xi32>
    %c0_14 = arith.constant 0 : index
    %c0_15 = arith.constant 0 : index
    %22 = vector.load %arg3[%c0_14, %c0_15] : memref<8x1xi32, #tpu.memory_space<vmem>>, vector<8x1xi32>
    %23 = vector.broadcast %22 : vector<8x1xi32> to vector<8x128xi32>
    %24 = arith.cmpi slt, %21, %23 : vector<8x128xi32>
    %cst_16 = arith.constant -1.000000e+30 : f32
    %25 = vector.broadcast %cst_16 : f32 to vector<8x128xf32>
    %26 = arith.select %24, %20, %25 : vector<8x128xi1>, vector<8x128xf32>
    %cst_17 = arith.constant dense<0xFF800000> : vector<8xf32>
    %27 = vector.multi_reduction <maximumf>, %26, %cst_17 [1] : vector<8x128xf32> to vector<8xf32>
    %28 = vector.shape_cast %27 : vector<8xf32> to vector<8x1xf32>
    %29 = vector.broadcast %28 : vector<8x1xf32> to vector<8x128xf32>
    %30 = arith.subf %26, %29 : vector<8x128xf32>
    %31 = math.exp %30 : vector<8x128xf32>
    %cst_18 = arith.constant dense<0.000000e+00> : vector<8xf32>
    %32 = vector.multi_reduction <add>, %31, %cst_18 [1] : vector<8x128xf32> to vector<8xf32>
    %33 = vector.shape_cast %32 : vector<8xf32> to vector<8x1xf32>
    %34 = vector.broadcast %33 : vector<8x1xf32> to vector<8x128xf32>
    %35 = arith.divf %31, %34 : vector<8x128xf32>
    %c0_19 = arith.constant 0 : index
    %c0_20 = arith.constant 0 : index
    %36 = vector.load %arg8[%c0_19, %c0_20] : memref<8x128xf32, #tpu.memory_space<vmem>>, vector<8x128xf32>
    tpu.vector_store %arg8[%c0_19, %c0_20], %35 {strides = array<i32>} : memref<8x128xf32, #tpu.memory_space<vmem>>, vector<8x128xf32>,
    return
  }
  func.func @transform_0(%arg0: i32) -> (i32, i32) {
    %c0_i32 = arith.constant 0 : i32
    %c0_i32_0 = arith.constant 0 : i32
    return %arg0, %c0_i32 : i32, i32
  }
  func.func @transform_1(%arg0: i32) -> (i32, i32, i32) {
    %c0_i32 = arith.constant 0 : i32
    %c0_i32_0 = arith.constant 0 : i32
    %c0_i32_1 = arith.constant 0 : i32
    return %arg0, %c0_i32, %c0_i32_0 : i32, i32, i32
  }
  func.func @transform_2(%arg0: i32) -> (i32, i32) {
    %c0_i32 = arith.constant 0 : i32
    %c0_i32_0 = arith.constant 0 : i32
    return %arg0, %c0_i32 : i32, i32
  }
  func.func @transform_3(%arg0: i32) -> (i32, i32) {
    %c0_i32 = arith.constant 0 : i32
    %c0_i32_0 = arith.constant 0 : i32
    %c0_i32_1 = arith.constant 0 : i32
    return %c0_i32, %c0_i32_0 : i32, i32
  }
  func.func @transform_4(%arg0: i32) -> (i32, i32) {
    %c0_i32 = arith.constant 0 : i32
    %c0_i32_0 = arith.constant 0 : i32
    %c0_i32_1 = arith.constant 0 : i32
    return %c0_i32, %c0_i32_0 : i32, i32
  }
  func.func @transform_5(%arg0: i32) -> (i32, i32) {
    %c0_i32 = arith.constant 0 : i32
    %c0_i32_0 = arith.constant 0 : i32
    %c0_i32_1 = arith.constant 0 : i32
    return %c0_i32, %c0_i32_0 : i32, i32
  }
  func.func @transform_6(%arg0: i32) -> (i32, i32) {
    %c0_i32 = arith.constant 0 : i32
    %c0_i32_0 = arith.constant 0 : i32
    %c0_i32_1 = arith.constant 0 : i32
    return %c0_i32, %c0_i32_0 : i32, i32
  }
  func.func @transform_7(%arg0: i32) -> (i32, i32) {
    %c0_i32 = arith.constant 0 : i32
    %c0_i32_0 = arith.constant 0 : i32
    return %arg0, %c0_i32 : i32, i32
  }
}

</mosaic_0001>

<bundles_post_ra>
// kernel: tpu_custom_call.1
= control target key start
LH: loop header
LB: loop body
LE: loop exit
PB: predicated region body
PF: predicated region fallthrough
CT: control target
= control target key end

     0   :  { %v3562_v1 = vmov 0.0   ;;  %vm552_vm0 = vcmask 130048   ;;  %vm3563_vm1 = vmmov 0   ;;  %vm52_vm2 = vcmask 261120   ;;  %s4841_s0 = inlined_call_operand.vmem [shape: bf16[8,32], index: 0, kind: input, shape index: {}]   ;;  %s4842_s1 = inlined_call_operand.vmem [shape: bf16[8,128,16], index: 1, kind: input, shape index: {}]   ;;  %s4843_s2 = inlined_call_operand.vmem [shape: s32[8,1], index: 2, kind: input, shape index: {}]   ;;  %s4844_s3 = inlined_call_operand.vmem [shape: bf16[32,128], index: 3, kind: input, shape index: {}]   ;;  %s4845_s4 = inlined_call_operand.vmem [shape: bf16[16,128], index: 4, kind: input, shape index: {}]   ;;  %s4846_s5 = inlined_call_operand.vmem [shape: f32[1,128], index: 5, kind: input, shape index: {}]   ;;  %s4847_s6 = inlined_call_operand.vmem [shape: f32[1,128], index: 6, kind: input, shape index: {}]   ;;  %s4848_s7 = inlined_call_operand.hbm [shape: f32[8,128], index: 7, kind: output, shape index: {}]  }
   0x1   :  { %v3212_v0 = vld [vmem:[%s4844_s3 + $0x8] sm:$0xff]   ;;  %3066 = vmatprep.subr.bf16.mxu0 %v3562_v1  ;;  %v3213_v2 = vld [vmem:[%s4845_s4] sm:$0xff]   ;;  %v3214_v3 = vld [vmem:[%s4842_s1 + $0xf0] sm:$0xff]   ;;  %3070 = vmatprep.mubr.msk.bf16.mxu0 %vm3563_vm1, %v3562_v1 }
   0x2   :  { %3067 = vmatpush3.bf16.msra.mxu0 %v3212_v0  ;;  %3204 = vmatprep.subr.bf16.mxu1 %v3213_v2  ;;  %v3215_v4 = vld [vmem:[%s4844_s3] sm:$0xff]   ;;  %v3216_v5 = vld [vmem:[%s4842_s1 + $0xf8] sm:$0xff]   ;;  %v3218_v9 = vld [vmem:[%s4842_s1 + $0x108] sm:$0xff]  }
   0x3   :  { %3068 = vmatprep.subr.bf16.mxu0 %v3562_v1  ;;  %3205 = vmatpush3.bf16.msra.mxu1 %v3213_v2  ;;  %v28_v6 = vld [vmem:[%s4841_s0] sm:$0xf]  ;;  %v3221_v10 = vld [vmem:[%s4842_s1 + $0x110] sm:$0xff]   ;;  %v3220_v11 = vld [vmem:[%s4842_s1 + $0x8] sm:$0xff]  }
   0x4   :  { %3136 = vmatprep.mubr.msk.bf16.mxu1 %vm552_vm0, %v3214_v3  ;;  %v3217_v7 = vld [vmem:[%s4842_s1 + $0x100] sm:$0xff]   ;;  %v3223_v12 = vld [vmem:[%s4842_s1 + $0x10] sm:$0xff]   ;;  %v3222_v13 = vld [vmem:[%s4842_s1 + $0x118] sm:$0xff]  }
   0x5   :  { %v3219_v8 = vld [vmem:[%s4842_s1] sm:$0xff]   ;;  %v3224_v15 = vld [vmem:[%s4842_s1 + $0x18] sm:$0xff]   ;;  %v3226_v17 = vld [vmem:[%s4842_s1 + $0x128] sm:$0xff]  }
   0x6   :  { %3069 = vmatpush3.bf16.msra.mxu0 %v3215_v4  ;;  %3137 = vmatmul.mubr.msk.bf16.vlgmr.msra.gmra.mxu1 %vm552_vm0, %v3216_v5  ;;  %v3225_v14 = vld [vmem:[%s4842_s1 + $0x120] sm:$0xff]   ;;  %v3229_v18 = vld [vmem:[%s4842_s1 + $0x130] sm:$0xff]   ;;  %v3228_v19 = vld [vmem:[%s4842_s1 + $0x28] sm:$0xff]  }
   0x7   :  { %3074 = vmatprep.subr.bf16.mxu0 %v3213_v2  ;;  %3140 = vmatprep.mubr.msk.bf16.mxu1 %vm552_vm0, %v3217_v7  ;;  %v3227_v16 = vld [vmem:[%s4842_s1 + $0x20] sm:$0xff]   ;;  %v3231_v20 = vld [vmem:[%s4842_s1 + $0x30] sm:$0xff]   ;;  %v3230_v21 = vld [vmem:[%s4842_s1 + $0x138] sm:$0xff]  }
   0x8   :  { %v3233_v22 = vld [vmem:[%s4842_s1 + $0x140] sm:$0xff]   ;;  %v3232_v23 = vld [vmem:[%s4842_s1 + $0x38] sm:$0xff]   ;;  %v3234_v25 = vld [vmem:[%s4842_s1 + $0x148] sm:$0xff]  }
   0x9   :  { %3071 = vmatmul.mubr.msk.bf16.vlgmr.msra.gmra.mxu0 %vm52_vm2, %v28_v6  ;;  %v3235_v24 = vld [vmem:[%s4842_s1 + $0x40] sm:$0xff]   ;;  %v3237_v26 = vld [vmem:[%s4842_s1 + $0x150] sm:$0xff]   ;;  %v3236_v27 = vld [vmem:[%s4842_s1 + $0x48] sm:$0xff]  }
   0xa   :  { %3075 = vmatpush3.bf16.msra.mxu0 %v3213_v2  ;;  %3076 = vmatprep.mubr.msk.bf16.mxu0 %vm552_vm0, %v3219_v8  ;;  %v3239_v28 = vld [vmem:[%s4842_s1 + $0x50] sm:$0xff]   ;;  %v3238_v29 = vld [vmem:[%s4842_s1 + $0x158] sm:$0xff]   ;;  %v3241_v30 = vld [vmem:[%s4842_s1 + $0x160] sm:$0xff]  }
   0xb   :  { %v3240_v31 = vld [vmem:[%s4842_s1 + $0x58] sm:$0xff]   ;;  %v3243_v32 = vld [vmem:[%s4842_s1 + $0x60] sm:$0xff]   ;;  %v3242_v33 = vld [vmem:[%s4842_s1 + $0x168] sm:$0xff]  }
   0xc   :  { %v3245_v34 = vld [vmem:[%s4842_s1 + $0x170] sm:$0xff]   ;;  %v3244_v35 = vld [vmem:[%s4842_s1 + $0x68] sm:$0xff]   ;;  %v3246_v37 = vld [vmem:[%s4842_s1 + $0x178] sm:$0xff]  }
   0xd   :  { %v3247_v36 = vld [vmem:[%s4842_s1 + $0x70] sm:$0xff]  }
   0xe   :  { %3141 = vmatmul.mubr.msk.bf16.gmra.mxu1 %vm552_vm0, %v3218_v9 }
   0xf   :  { %3144 = vmatprep.mubr.msk.bf16.mxu1 %vm552_vm0, %v3221_v10 }
  0x11   :  { %3077 = vmatmul.mubr.msk.bf16.vlgmr.msra.gmra.mxu0 %vm552_vm0, %v3220_v11 }
  0x12   :  { %3080 = vmatprep.mubr.msk.bf16.mxu0 %vm552_vm0, %v3223_v12 }
  0x16   :  { %3145 = vmatmul.mubr.msk.bf16.gmra.mxu1 %vm552_vm0, %v3222_v13 }
  0x17   :  { %3148 = vmatprep.mubr.msk.bf16.mxu1 %vm552_vm0, %v3225_v14 }
  0x19   :  { %3081 = vmatmul.mubr.msk.bf16.gmra.mxu0 %vm552_vm0, %v3224_v15 }
  0x1a   :  { %3084 = vmatprep.mubr.msk.bf16.mxu0 %vm552_vm0, %v3227_v16 }
  0x1e   :  { %3149 = vmatmul.mubr.msk.bf16.gmra.mxu1 %vm552_vm0, %v3226_v17 }
  0x1f   :  { %3152 = vmatprep.mubr.msk.bf16.mxu1 %vm552_vm0, %v3229_v18 }
  0x21   :  { %3085 = vmatmul.mubr.msk.bf16.gmra.mxu0 %vm552_vm0, %v3228_v19 }
  0x22   :  { %3088 = vmatprep.mubr.msk.bf16.mxu0 %vm552_vm0, %v3231_v20 }
  0x26   :  { %3153 = vmatmul.mubr.msk.bf16.gmra.mxu1 %vm552_vm0, %v3230_v21 }
  0x27   :  { %3156 = vmatprep.mubr.msk.bf16.mxu1 %vm552_vm0, %v3233_v22 }
  0x29   :  { %3089 = vmatmul.mubr.msk.bf16.gmra.mxu0 %vm552_vm0, %v3232_v23 }
  0x2a   :  { %3092 = vmatprep.mubr.msk.bf16.mxu0 %vm552_vm0, %v3235_v24 }
  0x2e   :  { %3157 = vmatmul.mubr.msk.bf16.gmra.mxu1 %vm552_vm0, %v3234_v25 }
  0x2f   :  { %3160 = vmatprep.mubr.msk.bf16.mxu1 %vm552_vm0, %v3237_v26 }
  0x31   :  { %3093 = vmatmul.mubr.msk.bf16.gmra.mxu0 %vm552_vm0, %v3236_v27 }
  0x32   :  { %3096 = vmatprep.mubr.msk.bf16.mxu0 %vm552_vm0, %v3239_v28 }
  0x36   :  { %3161 = vmatmul.mubr.msk.bf16.gmra.mxu1 %vm552_vm0, %v3238_v29 }
  0x37   :  { %3164 = vmatprep.mubr.msk.bf16.mxu1 %vm552_vm0, %v3241_v30 }
  0x39   :  { %3097 = vmatmul.mubr.msk.bf16.gmra.mxu0 %vm552_vm0, %v3240_v31 }
  0x3a   :  { %3100 = vmatprep.mubr.msk.bf16.mxu0 %vm552_vm0, %v3243_v32 }
  0x3e   :  { %3165 = vmatmul.mubr.msk.bf16.gmra.mxu1 %vm552_vm0, %v3242_v33 }
  0x3f   :  { %3168 = vmatprep.mubr.msk.bf16.mxu1 %vm552_vm0, %v3245_v34 }
  0x41   :  { %3101 = vmatmul.mubr.msk.bf16.gmra.mxu0 %vm552_vm0, %v3244_v35 }
  0x42   :  { %3104 = vmatprep.mubr.msk.bf16.mxu0 %vm552_vm0, %v3247_v36 }
  0x43   :  { %12 = vsyncpa [#allocation3], 0  ;;  %v3249_v38 = vld [vmem:[%s4842_s1 + $0x180] sm:$0xff]   ;;  %v3248_v39 = vld [vmem:[%s4842_s1 + $0x78] sm:$0xff]   ;;  %v3564_v5 = vmov 1966171168   ;;  %v1295_v7 = vlaneseq }
  0x44   :  { %v3251_v40 = vld [vmem:[%s4842_s1 + $0x80] sm:$0xff]   ;;  %v3250_v41 = vld [vmem:[%s4842_s1 + $0x188] sm:$0xff]   ;;  %v3253_v42 = vld [vmem:[%s4842_s1 + $0x190] sm:$0xff]   ;;  %v1293_v6 = vunpack.c.l.s4 %v3564_v5  ;;  %vm2171_vm3 = vcmask 130112   ;;  %vm2178_vm4 = vcmask 195712   ;;  %vm2185_vm5 = vcmask 261312  }
  0x45   :  { %v3252_v43 = vld [vmem:[%s4842_s1 + $0x88] sm:$0xff]   ;;  %v3255_v44 = vld [vmem:[%s4842_s1 + $0x90] sm:$0xff]   ;;  %v3254_v45 = vld [vmem:[%s4842_s1 + $0x198] sm:$0xff]   ;;  %v3876_v9 = vshrl.u32 %v1295_v7, 7  ;;  %vm2192_vm6 = vcmask 326912   ;;  %vm2199_vm7 = vcmask 392512  }
  0x46   :  { %3169 = vmatmul.mubr.msk.bf16.gmra.mxu1 %vm552_vm0, %v3246_v37  ;;  %v3257_v46 = vld [vmem:[%s4842_s1 + $0x1a0] sm:$0xff]   ;;  %v3256_v47 = vld [vmem:[%s4842_s1 + $0x98] sm:$0xff]   ;;  %v3258_v49 = vld [vmem:[%s4842_s1 + $0x1a8] sm:$0xff]   ;;  %v1294_v8 = vunpack.c.0.s8 %v1293_v6  ;;  %vm2206_vm8 = vcmask 458112   ;;  %vm2213_vm9 = vcmask 523712   ;;  %vm2220_vm10 = vcmask 589312  }
  0x47   :  { %3172 = vmatprep.mubr.msk.bf16.mxu1 %vm552_vm0, %v3249_v38  ;;  %v3259_v48 = vld [vmem:[%s4842_s1 + $0xa0] sm:$0xff]   ;;  %v3261_v50 = vld [vmem:[%s4842_s1 + $0x1b0] sm:$0xff]   ;;  %v3260_v51 = vld [vmem:[%s4842_s1 + $0xa8] sm:$0xff]   ;;  %v1342_v20 = vsub.s32 0, %v3876_v9  ;;  %vm2227_vm11 = vcmask 654912   ;;  %vm2234_vm12 = vcmask 720512  }
  0x48   :  { %v3263_v52 = vld [vmem:[%s4842_s1 + $0xb0] sm:$0xff]   ;;  %v3262_v53 = vld [vmem:[%s4842_s1 + $0x1b8] sm:$0xff]   ;;  %v3265_v54 = vld [vmem:[%s4842_s1 + $0x1c0] sm:$0xff]   ;;  %v1297_v12 = vsub.s32 %v1294_v8, %v3876_v9  ;;  %vm2241_vm13 = vcmask 786112   ;;  %vm2248_vm14 = vcmask 851712   ;;  %vm2255_vm15 = vcmask 917312  }
  0x49   :  { %3105 = vmatmul.mubr.msk.bf16.gmra.mxu0 %vm552_vm0, %v3248_v39  ;;  %v3264_v55 = vld [vmem:[%s4842_s1 + $0xb8] sm:$0xff]   ;;  %v3267_v56 = vld [vmem:[%s4842_s1 + $0xc0] sm:$0xff]   ;;  %v3266_v57 = vld [vmem:[%s4842_s1 + $0x1c8] sm:$0xff]   ;;  %vm2269_vm1 = vcmask 1048512   ;;  %vm2824_vm2 = vcmask 1041409  }
  0x4a   :  { %3108 = vmatprep.mubr.msk.bf16.mxu0 %vm552_vm0, %v3251_v40  ;;  %v3269_v58 = vld [vmem:[%s4842_s1 + $0x1d0] sm:$0xff]   ;;  %v3268_v59 = vld [vmem:[%s4842_s1 + $0xc8] sm:$0xff]   ;;  %v3270_v61 = vld [vmem:[%s4842_s1 + $0x1d8] sm:$0xff]  }
  0x4b   :  { %v3271_v60 = vld [vmem:[%s4842_s1 + $0xd0] sm:$0xff]   ;;  %v3273_v62 = vld [vmem:[%s4842_s1 + $0x1e0] sm:$0xff]   ;;  %v3272_v63 = vld [vmem:[%s4842_s1 + $0xd8] sm:$0xff]  }
  0x4c   :  { %v3275_v0 = vld [vmem:[%s4842_s1 + $0xe0] sm:$0xff]   ;;  %v3274_v1 = vld [vmem:[%s4842_s1 + $0x1e8] sm:$0xff]   ;;  %v3277_v2 = vld [vmem:[%s4842_s1 + $0x1f0] sm:$0xff]  }
  0x4d   :  { %v3276_v3 = vld [vmem:[%s4842_s1 + $0xe8] sm:$0xff]   ;;  %v3278_v4 = vld [vmem:[%s4842_s1 + $0x1f8] sm:$0xff]   ;;  %v2864_v11 = vld [vmem:[%s4846_s5] ss:$0 sm:$0xff] }
  0x4e   :  { %3173 = vmatmul.mubr.msk.bf16.gmra.mxu1 %vm552_vm0, %v3250_v41 }
  0x4f   :  { %3176 = vmatprep.mubr.msk.bf16.mxu1 %vm552_vm0, %v3253_v42 }
  0x51   :  { %3109 = vmatmul.mubr.msk.bf16.gmra.mxu0 %vm552_vm0, %v3252_v43 }
  0x52   :  { %3112 = vmatprep.mubr.msk.bf16.mxu0 %vm552_vm0, %v3255_v44 }
  0x56   :  { %3177 = vmatmul.mubr.msk.bf16.gmra.mxu1 %vm552_vm0, %v3254_v45 }
  0x57   :  { %3180 = vmatprep.mubr.msk.bf16.mxu1 %vm552_vm0, %v3257_v46 }
  0x59   :  { %3113 = vmatmul.mubr.msk.bf16.gmra.mxu0 %vm552_vm0, %v3256_v47 }
  0x5a   :  { %3116 = vmatprep.mubr.msk.bf16.mxu0 %vm552_vm0, %v3259_v48 }
  0x5e   :  { %3181 = vmatmul.mubr.msk.bf16.gmra.mxu1 %vm552_vm0, %v3258_v49 }
  0x5f   :  { %3184 = vmatprep.mubr.msk.bf16.mxu1 %vm552_vm0, %v3261_v50 }
  0x61   :  { %3117 = vmatmul.mubr.msk.bf16.gmra.mxu0 %vm552_vm0, %v3260_v51 }
  0x62   :  { %3120 = vmatprep.mubr.msk.bf16.mxu0 %vm552_vm0, %v3263_v52 }
  0x66   :  { %3185 = vmatmul.mubr.msk.bf16.gmra.mxu1 %vm552_vm0, %v3262_v53 }
  0x67   :  { %3188 = vmatprep.mubr.msk.bf16.mxu1 %vm552_vm0, %v3265_v54 }
  0x69   :  { %3121 = vmatmul.mubr.msk.bf16.gmra.mxu0 %vm552_vm0, %v3264_v55 }
  0x6a   :  { %3124 = vmatprep.mubr.msk.bf16.mxu0 %vm552_vm0, %v3267_v56 }
  0x6e   :  { %3189 = vmatmul.mubr.msk.bf16.gmra.mxu1 %vm552_vm0, %v3266_v57 }
  0x6f   :  { %3192 = vmatprep.mubr.msk.bf16.mxu1 %vm552_vm0, %v3269_v58 }
  0x71   :  { %3125 = vmatmul.mubr.msk.bf16.gmra.mxu0 %vm552_vm0, %v3268_v59 }
  0x72   :  { %3128 = vmatprep.mubr.msk.bf16.mxu0 %vm552_vm0, %v3271_v60 }
  0x76   :  { %3193 = vmatmul.mubr.msk.bf16.gmra.mxu1 %vm552_vm0, %v3270_v61 }
  0x77   :  { %3196 = vmatprep.mubr.msk.bf16.mxu1 %vm552_vm0, %v3273_v62  ;;  %v3922_v62 = vld [vmem:[%s4847_s6] ss:$0 sm:$0xff] }
  0x79   :  { %3129 = vmatmul.mubr.msk.bf16.gmra.mxu0 %vm552_vm0, %v3272_v63 }
  0x7a   :  { %3132 = vmatprep.mubr.msk.bf16.mxu0 %vm552_vm0, %v3275_v0 }
  0x7e   :  { %3197 = vmatmul.mubr.msk.bf16.gmra.mxu1 %vm552_vm0, %v3274_v1 }
  0x7f   :  { %3200 = vmatprep.mubr.msk.bf16.mxu1 %vm552_vm0, %v3277_v2 }
  0x81   :  { %3133 = vmatmul.mubr.msk.bf16.gmra.mxu0 %vm552_vm0, %v3276_v3 }
  0x86   :  { %3201 = vmatmul.mubr.msk.bf16.gmra.mxu1 %vm552_vm0, %v3278_v4  ;;  %vm2262_vm0 = vcmask 982912  }
  0xc6   :  { %v3878_v10 = vpop.f32.mrf.mxu1 }
  0xc8   :  { %v3884_v13 = vpop.f32.mrf.mxu1 }
  0xc9   :  { %v90_v14 = vpop.f32.mrf.mxu0 }
  0xca   :  { %v91_v15 = vadd.f32 %v2864_v11, %v90_v14  ;;  %v3139_v16 = vpop.f32.mrf.mxu1 }
  0xcb   :  { %v3072_v17 = vpop.f32.mrf.mxu0 }
  0xcc   :  { %v1291_v18 = vcombine.high %v91_v15, %v91_v15  ;;  %v1298_v19 = vrot.slane %v91_v15, %v1297_v12  ;;  %v3887_v21 = vpop.f32.mrf.mxu1 }
  0xcd   :  { %v93_v22 = vpop.f32.mrf.mxu0 }
  0xce   :  { %v1305_v23 = vrot.slane %v1291_v18, %v1297_v12  ;;  %v1306_v24 = vcombine.high %v1298_v19, %v1298_v19  ;;  %v1314_v25 = vrot.slane %v1298_v19, %v1297_v12  ;;  %v3142_v26 = vpop.f32.mrf.mxu1 }
  0xcf   :  { %v3073_v27 = vpop.f32.mrf.mxu0 }
  0xd0   :  { %v1307_v28 = vcombine.high %v1305_v23, %v1305_v23  ;;  %v1321_v29 = vrot.slane %v1305_v23, %v1297_v12  ;;  %v1328_v30 = vrot.slane %v1306_v24, %v1297_v12  ;;  %v1336_v31 = vcombine.high %v1314_v25, %v1314_v25  ;;  %v1035_v33 = vpop.f32.mrf.mxu1 }
  0xd1   :  { %v3889_v32 = vrot.slane %v1314_v25, %v1342_v20  ;;  %v3078_v34 = vpop.f32.mrf.mxu0 }
  0xd2   :  { %v1335_v35 = vrot.slane %v1307_v28, %v1297_v12  ;;  %v1337_v36 = vcombine.high %v1321_v29, %v1321_v29  ;;  %v3891_v37 = vrot.slane %v1328_v30, %v1342_v20  ;;  %v3893_v38 = vrot.slane %v1336_v31, %v1342_v20  ;;  %v3143_v41 = vpop.f32.mrf.mxu1 }
  0xd3   :  { %v3895_v39 = vrot.slane %v1321_v29, %v1342_v20  ;;  %v1382_v40 = vadd.f32 %v3078_v34, %v3889_v32  ;;  %v779_v42 = vpop.f32.mrf.mxu0  ;;  %v1338_v43 = vcombine.high %v1328_v30, %v1328_v30 }
  0xd4   :  { %v1339_v44 = vcombine.high %v1335_v35, %v1335_v35  ;;  %v3898_v45 = vrot.slane %v1335_v35, %v1342_v20  ;;  %v3900_v46 = vrot.slane %v1337_v36, %v1342_v20  ;;  %v1038_v47 = vpop.f32.mrf.mxu1  ;;  %v1380_v52 = vadd.f32 %v3889_v32, %v779_v42 }
  0xd5   :  { %3279 = vtanh.f32 %v1382_v40  ;;  %v3079_v48 = vpop.f32.mrf.mxu0  ;;  %v1444_v50 = vadd.f32 %v3895_v39, %v1035_v33  ;;  %v3905_v51 = vrot.slane %v1338_v43, %v1342_v20  ;;  %v1446_v53 = vadd.f32 %v3142_v26, %v3895_v39 }
  0xd6   :  { %v3902_v49 = vrot.slane %v1339_v44, %v1342_v20  ;;  %v3909_v54 = vpop.f32.mrf.mxu1  ;;  %v1383_v56 = vadd.f32 %v3079_v48, %v3889_v32  ;;  %v1447_v60 = vadd.f32 %v3143_v41, %v3895_v39  ;;  %v1445_v2 = vadd.f32 %v3895_v39, %v1038_v47 }
  0xd7   :  { %v3911_v55 = vpop.f32.mrf.mxu0  ;;  %3281 = vtanh.f32 %v1444_v50  ;;  %v1443_v57 = vadd.f32 %v3139_v16, %v3905_v51 }
  0xd8   :  { %3283 = vtanh.f32 %v1380_v52  ;;  %v1051_v58 = vpop.f32.mrf.mxu1 }
  0xd9   :  { %3285 = vtanh.f32 %v1446_v53  ;;  %v3915_v59 = vpop.f32.mrf.mxu0  ;;  %v1448_v61 = vadd.f32 %v3895_v39, %v1051_v58 }
  0xda   :  { %3287 = vtanh.f32 %v1383_v56  ;;  %v3147_v63 = vpop.f32.mrf.mxu1 }
  0xdb   :  { %3289 = vtanh.f32 %v1443_v57  ;;  %v3924_v0 = vpop.f32.mrf.mxu0  ;;  %v1451_v4 = vadd.f32 %v3147_v63, %v3895_v39  ;;  %v1440_v57 = vadd.f32 %v3905_v51, %v3884_v13 }
  0xdc   :  { %3291 = vtanh.f32 %v1447_v60  ;;  %v1054_v5 = vpop.f32.mrf.mxu1 }
  0xdd   :  { %3293 = vtanh.f32 %v1448_v61  ;;  %v3083_v6 = vpop.f32.mrf.mxu0  ;;  %v1449_v11 = vadd.f32 %v3895_v39, %v1054_v5 }
  0xde   :  { %3295 = vtanh.f32 %v1445_v2  ;;  %v3150_v15 = vpop.f32.mrf.mxu1  ;;  %v1387_v20 = vadd.f32 %v3083_v6, %v3889_v32 }
  0xdf   :  { %3297 = vtanh.f32 %v1451_v4  ;;  %v798_v16 = vpop.f32.mrf.mxu0  ;;  %v1454_v28 = vadd.f32 %v3150_v15, %v3895_v39  ;;  %v1450_v15 = vadd.f32 %v3909_v54, %v3895_v39 }
  0xe0   :  { %3299 = vtanh.f32 %v1449_v11  ;;  %v3934_v24 = vpop.f32.mrf.mxu1  ;;  %v1385_v36 = vadd.f32 %v3889_v32, %v798_v16 }
  0xe1   :  { %v3936_v25 = vpop.f32.mrf.mxu0  ;;  %3301 = vtanh.f32 %v1387_v20 }
  0xe2   :  { %v3280_v1 = vpop.eup %3279  ;;  %v3151_v31 = vpop.f32.mrf.mxu1  ;;  %3303 = vtanh.f32 %v1454_v28 }
  0xe3   :  { %v1645_v3 = vmul.f32 %v3280_v1, %v3922_v62  ;;  %v3941_v33 = vpop.f32.mrf.mxu0  ;;  %3305 = vtanh.f32 %v1385_v36  ;;  %v1455_v47 = vadd.f32 %v3151_v31, %v3895_v39  ;;  %v1441_v1 = vadd.f32 %v3905_v51, %v3887_v21 }
  0xe4   :  { %v3282_v8 = vpop.eup %3281  ;;  %v1070_v42 = vpop.f32.mrf.mxu1  ;;  %v1386_v31 = vadd.f32 %v3915_v59, %v3889_v32 }
  0xe5   :  { %1775 = vadd.xlane.f32.xlu1 %v1645_v3  ;;  %v1707_v12 = vmul.f32 %v3282_v8, %v3922_v62  ;;  %v3284_v14 = vpop.eup %3283  ;;  %v3087_v43 = vpop.f32.mrf.mxu0  ;;  %v1453_v56 = vadd.f32 %v3895_v39, %v1070_v42  ;;  %3307 = vtanh.f32 %v1455_v47  ;;  %v1384_v42 = vadd.f32 %v3889_v32, %v3924_v0 }
  0xe6   :  { %v3286_v17 = vpop.eup %3285  ;;  %v1643_v18 = vmul.f32 %v3284_v14, %v3922_v62  ;;  %v3949_v52 = vpop.f32.mrf.mxu1  ;;  %v1391_v2 = vadd.f32 %v3087_v43, %v3889_v32  ;;  %v1442_v14 = vadd.f32 %v3878_v10, %v3905_v51 }
  0xe7   :  { %v3288_v19 = vpop.eup %3287  ;;  %v1709_v26 = vmul.f32 %v3286_v17, %v3922_v62  ;;  %v814_v53 = vpop.f32.mrf.mxu0  ;;  %3309 = vtanh.f32 %v1453_v56 }
  0xe8   :  { %1771 = vadd.xlane.f32.xlu0 %v1643_v18  ;;  %v1646_v22 = vmul.f32 %v3288_v19, %v3922_v62  ;;  %v3290_v23 = vpop.eup %3289  ;;  %v1083_v61 = vpop.f32.mrf.mxu1  ;;  %3311 = vtanh.f32 %v1440_v57  ;;  %v1389_v13 = vadd.f32 %v3889_v32, %v814_v53  ;;  %v1452_v53 = vadd.f32 %v3895_v39, %v3934_v24 }
  0xe9   :  { %1899 = vadd.xlane.f32.xlu1 %v1707_v12  ;;  %v3292_v27 = vpop.eup %3291  ;;  %v1706_v29 = vmul.f32 %v3290_v23, %v3922_v62  ;;  %v3090_v63 = vpop.f32.mrf.mxu0  ;;  %3313 = vtanh.f32 %v1441_v1  ;;  %v1456_v16 = vadd.f32 %v3895_v39, %v1083_v61  ;;  %v1390_v1 = vadd.f32 %v3936_v25, %v3889_v32 }
  0xea   :  { %v3294_v30 = vpop.eup %3293  ;;  %v1710_v34 = vmul.f32 %v3292_v27, %v3922_v62  ;;  %v3959_v5 = vpop.f32.mrf.mxu1  ;;  %3315 = vtanh.f32 %v1391_v2  ;;  %v1394_v10 = vadd.f32 %v3090_v63, %v3889_v32 }
  0xeb   :  { %v3296_v35 = vpop.eup %3295  ;;  %v1711_v40 = vmul.f32 %v3294_v30, %v3922_v62  ;;  %v3961_v6 = vpop.f32.mrf.mxu0  ;;  %3317 = vtanh.f32 %v1389_v13 }
  0xec   :  { %1903 = vadd.xlane.f32.xlu0 %v1709_v26  ;;  %v3298_v41 = vpop.eup %3297  ;;  %v1708_v44 = vmul.f32 %v3296_v35, %v3922_v62  ;;  %v1086_v11 = vpop.f32.mrf.mxu1  ;;  %3319 = vtanh.f32 %v1442_v14 }
  0xed   :  { %1777 = vadd.xlane.f32.xlu1 %v1646_v22  ;;  %v1714_v48 = vmul.f32 %v3298_v41, %v3922_v62  ;;  %v3300_v50 = vpop.eup %3299  ;;  %v3091_v12 = vpop.f32.mrf.mxu0  ;;  %3321 = vtanh.f32 %v1450_v15  ;;  %v1381_v22 = vadd.f32 %v3889_v32, %v3911_v55  ;;  %v1457_v55 = vadd.f32 %v3895_v39, %v1086_v11 }
  0xee   :  { %v1712_v58 = vmul.f32 %v3300_v50, %v3922_v62  ;;  %v3302_v60 = vpop.eup %3301  ;;  %v3158_v19 = vpop.f32.mrf.mxu1  ;;  %3323 = vtanh.f32 %v1456_v16  ;;  %v1395_v59 = vadd.f32 %v3091_v12, %v3889_v32  ;;  %v1388_v11 = vadd.f32 %v3889_v32, %v3941_v33 }
  0xef   :  { %v1650_v3 = vmul.f32 %v3302_v60, %v3922_v62  ;;  %v3304_v4 = vpop.eup %3303  ;;  %v830_v20 = vpop.f32.mrf.mxu0  ;;  %3325 = vtanh.f32 %v1381_v22  ;;  %v1462_v57 = vadd.f32 %v3158_v19, %v3898_v45  ;;  %v1458_v19 = vadd.f32 %v3949_v52, %v3895_v39 }
  0xf0   :  { %1905 = vadd.xlane.f32.xlu0 %v1710_v34  ;;  %v1717_v8 = vmul.f32 %v3304_v4, %v3922_v62  ;;  %v3306_v21 = vpop.eup %3305  ;;  %v1099_v27 = vpop.f32.mrf.mxu1  ;;  %3327 = vtanh.f32 %v1394_v10 }
  0xf1   :  { %1897 = vadd.xlane.f32.xlu1 %v1706_v29  ;;  %v1648_v17 = vmul.f32 %v3306_v21, %v3922_v62  ;;  %v3975_v28 = vpop.f32.mrf.mxu0  ;;  %3329 = vtanh.f32 %v1386_v31  ;;  %v1460_v14 = vadd.f32 %v3898_v45, %v1099_v27  ;;  %v1459_v27 = vadd.f32 %v3959_v5, %v3895_v39 }
  0xf2   :  { %v3308_v18 = vpop.eup %3307  ;;  %v3982_v36 = vpop.f32.mrf.mxu1  ;;  %3331 = vtanh.f32 %v1457_v55  ;;  %v1398_v22 = vadd.f32 %v3975_v28, %v3891_v37 }
  0xf3   :  { %v1718_v54 = vmul.f32 %v3308_v18, %v3922_v62  ;;  %3333 = vtanh.f32 %v1384_v42 }
  0xf4   :  { %1901 = vadd.xlane.f32.xlu0 %v1708_v44  ;;  %v3310_v23 = vpop.eup %3309  ;;  %v3991_v47 = vpop.f32.mrf.mxu1  ;;  %3335 = vtanh.f32 %v1395_v59 }
  0xf5   :  { %1907 = vadd.xlane.f32.xlu1 %v1711_v40  ;;  %v3312_v26 = vpop.eup %3311  ;;  %v1716_v34 = vmul.f32 %v3310_v23, %v3922_v62  ;;  %v3984_v40 = vpop.f32.mrf.mxu0  ;;  %3337 = vtanh.f32 %v1452_v53 }
  0xf6   :  { %v1703_v29 = vmul.f32 %v3312_v26, %v3922_v62  ;;  %v3314_v30 = vpop.eup %3313  ;;  %v4000_v61 = vpop.f32.mrf.mxu1  ;;  %3339 = vtanh.f32 %v1462_v57 }
  0xf7   :  { %v3316_v35 = vpop.eup %3315  ;;  %v1704_v41 = vmul.f32 %v3314_v30, %v3922_v62  ;;  %3341 = vtanh.f32 %v1390_v1  ;;  %v1396_v30 = vadd.f32 %v3891_v37, %v3984_v40 }
  0xf8   :  { %1891 = vadd.xlane.f32.xlu0 %v1703_v29  ;;  %v1654_v43 = vmul.f32 %v3316_v35, %v3922_v62  ;;  %v3318_v44 = vpop.eup %3317  ;;  %v1392_v35 = vadd.f32 %v3889_v32, %v3961_v6 }
  0xf9   :  { %1913 = vadd.xlane.f32.xlu1 %v1714_v48  ;;  %v3993_v48 = vpop.f32.mrf.mxu0  ;;  %v3320_v50 = vpop.eup %3319 }
  0xfa   :  { %v1705_v56 = vmul.f32 %v3320_v50, %v3922_v62  ;;  %v3322_v0 = vpop.eup %3321 }
  0xfb   :  { %v3324_v60 = vpop.eup %3323  ;;  %v4002_v63 = vpop.f32.mrf.mxu0  ;;  %v1713_v24 = vmul.f32 %v3322_v0, %v3922_v62 }
  0xfc   :  { %1893 = vadd.xlane.f32.xlu0 %v1704_v41  ;;  %v3326_v2 = vpop.eup %3325  ;;  %v1719_v4 = vmul.f32 %v3324_v60, %v3922_v62 }
  0xfd   :  { %1909 = vadd.xlane.f32.xlu1 %v1712_v58  ;;  %v1652_v58 = vmul.f32 %v3318_v44, %v3922_v62  ;;  %v3328_v13 = vpop.eup %3327  ;;  %v3098_v21 = vpop.f32.mrf.mxu0  ;;  %v1644_v25 = vmul.f32 %v3326_v2, %v3922_v62  ;;  %v1463_v44 = vadd.f32 %v3982_v36, %v3898_v45 }
  0xfe   :  { %v3330_v12 = vpop.eup %3329  ;;  %v1657_v15 = vmul.f32 %v3328_v13, %v3922_v62  ;;  %v1402_v41 = vadd.f32 %v3098_v21, %v3891_v37  ;;  %v1399_v13 = vadd.f32 %v3993_v48, %v3891_v37 }
  0xff   :  { %v3332_v16 = vpop.eup %3331  ;;  %v4016_v18 = vpop.f32.mrf.mxu0  ;;  %v1649_v33 = vmul.f32 %v3330_v12, %v3922_v62 }
 0x100   :  { %1895 = vadd.xlane.f32.xlu0 %v1705_v56  ;;  %v1720_v23 = vmul.f32 %v3332_v16, %v3922_v62  ;;  %v1466_v16 = vadd.f32 %v4000_v61, %v3898_v45 }
 0x101   :  { %1785 = vadd.xlane.f32.xlu1 %v1650_v3  ;;  %v1393_v3 = vadd.f32 %v3889_v32, %v830_v20  ;;  %v3334_v20 = vpop.eup %3333  ;;  %v4024_v26 = vpop.f32.mrf.mxu0 }
 0x102   :  { %v3336_v10 = vpop.eup %3335  ;;  %v1647_v52 = vmul.f32 %v3334_v20, %v3922_v62 }
 0x103   :  { %3343 = vtanh.f32 %v1393_v3  ;;  %v3338_v29 = vpop.eup %3337  ;;  %v1658_v28 = vmul.f32 %v3336_v10, %v3922_v62  ;;  %v1397_v10 = vadd.f32 %v3891_v37, %v4002_v63 }
 0x104   :  { %1911 = vadd.xlane.f32.xlu0 %v1713_v24  ;;  %3345 = vtanh.f32 %v1388_v11  ;;  %v3340_v31 = vpop.eup %3339  ;;  %v1715_v39 = vmul.f32 %v3338_v29, %v3922_v62 }
 0x105   :  { %1919 = vadd.xlane.f32.xlu1 %v1717_v8  ;;  %v4009_v8 = vpop.f32.mrf.mxu1  ;;  %3347 = vtanh.f32 %v1460_v14  ;;  %v3342_v5 = vpop.eup %3341  ;;  %v1725_v40 = vmul.f32 %v3340_v31, %v3922_v62 }
 0x106   :  { %3349 = vtanh.f32 %v1458_v19  ;;  %v1653_v32 = vmul.f32 %v3342_v5, %v3922_v62  ;;  %v1464_v31 = vadd.f32 %v3898_v45, %v4009_v8 }
 0x107   :  { %3351 = vtanh.f32 %v1398_v22 }
 0x108   :  { %1773 = vadd.xlane.f32.xlu0 %v1644_v25  ;;  %3353 = vtanh.f32 %v1459_v27 }
 0x109   :  { %1781 = vadd.xlane.f32.xlu1 %v1648_v17  ;;  %v3163_v17 = vpop.f32.mrf.mxu1  ;;  %3355 = vtanh.f32 %v1396_v30 }
 0x10a   :  { %3357 = vtanh.f32 %v1392_v35  ;;  %v1467_v50 = vadd.f32 %v3163_v17, %v3898_v45 }
 0x10b   :  { %3359 = vtanh.f32 %v1402_v41 }
 0x10c   :  { %1783 = vadd.xlane.f32.xlu0 %v1649_v33  ;;  %3361 = vtanh.f32 %v1463_v44 }
 0x10d   :  { %1921 = vadd.xlane.f32.xlu1 %v1718_v54  ;;  %v1118_v54 = vpop.f32.mrf.mxu1  ;;  %3363 = vtanh.f32 %v1467_v50 }
 0x10e   :  { %v1465_v1 = vadd.f32 %v3898_v45, %v1118_v54 }
 0x10f   :  { %v4032_v55 = vpop.f32.mrf.mxu1 }
 0x110   :  { %1779 = vadd.xlane.f32.xlu0 %v1647_v52  ;;  %v3344_v42 = vpop.eup %3343 }
 0x111   :  { %1917 = vadd.xlane.f32.xlu1 %v1716_v34  ;;  %v862_v34 = vpop.f32.mrf.mxu0  ;;  %v4039_v59 = vpop.f32.mrf.mxu1  ;;  %v1656_v53 = vmul.f32 %v3344_v42, %v3922_v62  ;;  %v1400_v42 = vadd.f32 %v3891_v37, %v4016_v18 }
 0x112   :  { %v3346_v6 = vpop.eup %3345  ;;  %v1401_v11 = vadd.f32 %v3891_v37, %v862_v34 }
 0x113   :  { %v3348_v56 = vpop.eup %3347  ;;  %v4048_v0 = vpop.f32.mrf.mxu1  ;;  %v1651_v36 = vmul.f32 %v3346_v6, %v3922_v62 }
 0x114   :  { %1915 = vadd.xlane.f32.xlu0 %v1715_v39  ;;  %v3350_v60 = vpop.eup %3349  ;;  %v1723_v24 = vmul.f32 %v3348_v56, %v3922_v62 }
 0x115   :  { %1793 = vadd.xlane.f32.xlu1 %v1654_v43  ;;  %v4041_v43 = vpop.f32.mrf.mxu0  ;;  %v3352_v2 = vpop.eup %3351 }
 0x116   :  { %v4057_v3 = vpop.f32.mrf.mxu1  ;;  %v3354_v21 = vpop.eup %3353  ;;  %v1661_v25 = vmul.f32 %v3352_v2, %v3922_v62 }
 0x117   :  { %v4050_v57 = vpop.f32.mrf.mxu0  ;;  %v3356_v12 = vpop.eup %3355  ;;  %v1722_v17 = vmul.f32 %v3354_v21, %v3922_v62 }
 0x118   :  { %1791 = vadd.xlane.f32.xlu0 %v1653_v32  ;;  %v3170_v14 = vpop.f32.mrf.mxu1  ;;  %v3358_v48 = vpop.eup %3357  ;;  %v1659_v33 = vmul.f32 %v3356_v12, %v3922_v62 }
 0x119   :  { %1789 = vadd.xlane.f32.xlu1 %v1652_v58  ;;  %v1461_v58 = vadd.f32 %v3898_v45, %v3991_v47  ;;  %v1721_v47 = vmul.f32 %v3350_v60, %v3922_v62  ;;  %v3360_v20 = vpop.eup %3359  ;;  %v1655_v61 = vmul.f32 %v3358_v48, %v3922_v62  ;;  %v1474_v27 = vadd.f32 %v3170_v14, %v3898_v45 }
 0x11a   :  { %v4069_v22 = vpop.f32.mrf.mxu1  ;;  %v3362_v54 = vpop.eup %3361  ;;  %v1665_v52 = vmul.f32 %v3360_v20, %v3922_v62  ;;  %v1468_v14 = vadd.f32 %v3898_v45, %v4039_v59  ;;  %v1406_v20 = vadd.f32 %v4041_v43, %v3891_v37 }
 0x11b   :  { %3365 = vtanh.f32 %v1461_v58  ;;  %v3364_v29 = vpop.eup %3363  ;;  %v1726_v63 = vmul.f32 %v3362_v54, %v3922_v62  ;;  %v1403_v58 = vadd.f32 %v4024_v26, %v3891_v37 }
 0x11c   :  { %1787 = vadd.xlane.f32.xlu0 %v1651_v36  ;;  %3367 = vtanh.f32 %v1465_v1  ;;  %v4078_v30 = vpop.f32.mrf.mxu1  ;;  %v1730_v39 = vmul.f32 %v3364_v29, %v3922_v62  ;;  %v1471_v29 = vadd.f32 %v4048_v0, %v3898_v45 }
 0x11d   :  { %1923 = vadd.xlane.f32.xlu1 %v1719_v4  ;;  %v3103_v4 = vpop.f32.mrf.mxu0  ;;  %3369 = vtanh.f32 %v1399_v13  ;;  %v1470_v13 = vadd.f32 %v4032_v55, %v3898_v45 }
 0x11e   :  { %3371 = vtanh.f32 %v1401_v11  ;;  %v1407_v19 = vadd.f32 %v3103_v4, %v3891_v37  ;;  %v1150_v41 = vpop.f32.mrf.mxu1 }
 0x11f   :  { %3373 = vtanh.f32 %v1466_v16  ;;  %v1473_v32 = vadd.f32 %v3898_v45, %v1150_v41  ;;  %v1404_v41 = vadd.f32 %v3891_v37, %v4050_v57 }
 0x120   :  { %1927 = vadd.xlane.f32.xlu0 %v1721_v47  ;;  %3375 = vtanh.f32 %v1407_v19 }
 0x121   :  { %1799 = vadd.xlane.f32.xlu1 %v1657_v15  ;;  %v878_v15 = vpop.f32.mrf.mxu0  ;;  %3377 = vtanh.f32 %v1397_v10 }
 0x122   :  { %3379 = vtanh.f32 %v1474_v27  ;;  %v1405_v35 = vadd.f32 %v3891_v37, %v878_v15 }
 0x123   :  { %3381 = vtanh.f32 %v1464_v31 }
 0x124   :  { %1929 = vadd.xlane.f32.xlu0 %v1722_v17  ;;  %3383 = vtanh.f32 %v1405_v35 }
 0x125   :  { %1925 = vadd.xlane.f32.xlu1 %v1720_v23  ;;  %v4071_v23 = vpop.f32.mrf.mxu0  ;;  %3385 = vtanh.f32 %v1400_v42 }
 0x126   :  { %3387 = vtanh.f32 %v1473_v32 }
 0x127   :  { %3389 = vtanh.f32 %v1403_v58 }
 0x128   :  { %1795 = vadd.xlane.f32.xlu0 %v1655_v61  ;;  %v3366_v34 = vpop.eup %3365 }
 0x129   :  { %1801 = vadd.xlane.f32.xlu1 %v1658_v28  ;;  %v4080_v28 = vpop.f32.mrf.mxu0  ;;  %v3368_v5 = vpop.eup %3367  ;;  %v1724_v8 = vmul.f32 %v3366_v34, %v3922_v62 }
 0x12a   :  { %v3370_v44 = vpop.eup %3369  ;;  %v1728_v6 = vmul.f32 %v3368_v5, %v3922_v62 }
 0x12b   :  { %v3372_v50 = vpop.eup %3371  ;;  %v1662_v18 = vmul.f32 %v3370_v44, %v3922_v62 }
 0x12c   :  { %1937 = vadd.xlane.f32.xlu0 %v1726_v63  ;;  %v3374_v36 = vpop.eup %3373  ;;  %v1664_v1 = vmul.f32 %v3372_v50, %v3922_v62 }
 0x12d   :  { %1935 = vadd.xlane.f32.xlu1 %v1725_v40  ;;  %v4087_v40 = vpop.f32.mrf.mxu0  ;;  %v1729_v26 = vmul.f32 %v3374_v36, %v3922_v62 }
 0x12f   :  { %v4094_v56 = vpop.f32.mrf.mxu0 }
 0x130   :  { %1933 = vadd.xlane.f32.xlu0 %v1724_v8 }
 0x131   :  { %1797 = vadd.xlane.f32.xlu1 %v1656_v53  ;;  %v3174_v53 = vpop.f32.mrf.mxu1  ;;  %v3110_v4 = vpop.f32.mrf.mxu0 }
 0x132   :  { %v1478_v60 = vadd.f32 %v3174_v53, %v3900_v46  ;;  %v1414_v21 = vadd.f32 %v3110_v4, %v3893_v38  ;;  %v1469_v53 = vadd.f32 %v3898_v45, %v4057_v3  ;;  %v1472_v4 = vadd.f32 %v3898_v45, %v4069_v22 }
 0x133   :  { %v4101_v2 = vpop.f32.mrf.mxu1  ;;  %v4113_v19 = vpop.f32.mrf.mxu0 }
 0x134   :  { %1809 = vadd.xlane.f32.xlu0 %v1662_v18  ;;  %3391 = vtanh.f32 %v1478_v60 }
 0x135   :  { %1931 = vadd.xlane.f32.xlu1 %v1723_v24  ;;  %v3376_v24 = vpop.eup %3375  ;;  %v3175_v12 = vpop.f32.mrf.mxu1  ;;  %3393 = vtanh.f32 %v1470_v13 }
 0x136   :  { %v3378_v47 = vpop.eup %3377  ;;  %v1670_v11 = vmul.f32 %v3376_v24, %v3922_v62  ;;  %3395 = vtanh.f32 %v1414_v21  ;;  %v1479_v55 = vadd.f32 %v3175_v12, %v3900_v46  ;;  %v1410_v12 = vadd.f32 %v4071_v23, %v3891_v37 }
 0x137   :  { %v1660_v15 = vmul.f32 %v3378_v47, %v3922_v62  ;;  %3397 = vtanh.f32 %v1468_v14 }
 0x138   :  { %1943 = vadd.xlane.f32.xlu0 %v1729_v26  ;;  %3399 = vtanh.f32 %v1479_v55 }
 0x139   :  { %1807 = vadd.xlane.f32.xlu1 %v1661_v25  ;;  %v3380_v25 = vpop.eup %3379  ;;  %3401 = vtanh.f32 %v1406_v20 }
 0x13a   :  { %v3382_v16 = vpop.eup %3381  ;;  %v1737_v17 = vmul.f32 %v3380_v25, %v3922_v62 }
 0x13b   :  { %v3384_v48 = vpop.eup %3383  ;;  %v1727_v59 = vmul.f32 %v3382_v16, %v3922_v62 }
 0x13c   :  { %1805 = vadd.xlane.f32.xlu0 %v1660_v15  ;;  %v3386_v10 = vpop.eup %3385  ;;  %v1668_v54 = vmul.f32 %v3384_v48, %v3922_v62  ;;  %v1475_v48 = vadd.f32 %v4078_v30, %v3898_v45  ;;  %v1408_v45 = vadd.f32 %v3891_v37, %v4080_v28  ;;  %v1411_v28 = vadd.f32 %v4087_v40, %v3891_v37 }
 0x13d   :  { %1803 = vadd.xlane.f32.xlu1 %v1659_v33  ;;  %v1166_v33 = vpop.f32.mrf.mxu1  ;;  %v3388_v27 = vpop.eup %3387  ;;  %v1663_v31 = vmul.f32 %v3386_v10, %v3922_v62 }
 0x13e   :  { %v1477_v61 = vadd.f32 %v3900_v46, %v1166_v33  ;;  %v3390_v63 = vpop.eup %3389  ;;  %v1736_v34 = vmul.f32 %v3388_v27, %v3922_v62 }
 0x13f   :  { %v1666_v0 = vmul.f32 %v3390_v63, %v3922_v62 }
 0x140   :  { %1939 = vadd.xlane.f32.xlu0 %v1727_v59  ;;  %3403 = vtanh.f32 %v1477_v61 }
 0x141   :  { %1815 = vadd.xlane.f32.xlu1 %v1665_v52  ;;  %v3111_v52 = vpop.f32.mrf.mxu0  ;;  %v3392_v35 = vpop.eup %3391  ;;  %3405 = vtanh.f32 %v1471_v29 }
 0x142   :  { %v1415_v43 = vadd.f32 %v3111_v52, %v3893_v38  ;;  %v3394_v42 = vpop.eup %3393  ;;  %v1741_v44 = vmul.f32 %v3392_v35, %v3922_v62 }
 0x143   :  { %v910_v5 = vpop.f32.mrf.mxu0  ;;  %v3396_v32 = vpop.eup %3395  ;;  %v1733_v57 = vmul.f32 %v3394_v42, %v3922_v62 }
 0x144   :  { %1811 = vadd.xlane.f32.xlu0 %v1663_v31  ;;  %3407 = vtanh.f32 %v1415_v43  ;;  %v1413_v8 = vadd.f32 %v3893_v38, %v910_v5  ;;  %v3398_v58 = vpop.eup %3397  ;;  %v1677_v36 = vmul.f32 %v3396_v32, %v3922_v62 }
 0x145   :  { %1945 = vadd.xlane.f32.xlu1 %v1730_v39  ;;  %v4125_v39 = vpop.f32.mrf.mxu1  ;;  %v3114_v50 = vpop.f32.mrf.mxu0  ;;  %3409 = vtanh.f32 %v1404_v41  ;;  %v1731_v3 = vmul.f32 %v3398_v58, %v3922_v62  ;;  %v4174_v41 = vand.u32 127, %v1295_v7 }
 0x146   :  { %3411 = vtanh.f32 %v1413_v8  ;;  %v1418_v18 = vadd.f32 %v3114_v50, %v3893_v38  ;;  %v3400_v60 = vpop.eup %3399 }
 0x147   :  { %v4139_v24 = vpop.f32.mrf.mxu0  ;;  %3413 = vtanh.f32 %v1469_v53  ;;  %v3402_v13 = vpop.eup %3401  ;;  %v1742_v47 = vmul.f32 %v3400_v60, %v3922_v62  ;;  %v2173_v58 = vadd.s32 4294967280, %v4174_v41  ;;  %v2180_v40 = vadd.s32 4294967272, %v4174_v41 }
 0x148   :  { %1817 = vadd.xlane.f32.xlu0 %v1666_v0  ;;  %3415 = vtanh.f32 %v1418_v18  ;;  %v1669_v14 = vmul.f32 %v3402_v13, %v3922_v62  ;;  %v2166_v18 = vadd.s32 4294967288, %v4174_v41 }
 0x149   :  { %1941 = vadd.xlane.f32.xlu1 %v1728_v6  ;;  %v4132_v6 = vpop.f32.mrf.mxu1  ;;  %v3115_v25 = vpop.f32.mrf.mxu0  ;;  %3417 = vtanh.f32 %v1472_v4  ;;  %v2187_v4 = vadd.s32 4294967264, %v4174_v41 }
 0x14a   :  { %v1419_v59 = vadd.f32 %v3115_v25, %v3893_v38 }
 0x14c   :  { %1951 = vadd.xlane.f32.xlu0 %v1733_v57 }
 0x14d   :  { %1813 = vadd.xlane.f32.xlu1 %v1664_v1  ;;  %v3179_v1 = vpop.f32.mrf.mxu1  ;;  %v3404_v21 = vpop.eup %3403 }
 0x14e   :  { %v1483_v26 = vadd.f32 %v3179_v1, %v3900_v46  ;;  %v3406_v22 = vpop.eup %3405  ;;  %v1740_v16 = vmul.f32 %v3404_v21, %v3922_v62 }
 0x14f   :  { %v1734_v23 = vmul.f32 %v3406_v22, %v3922_v62  ;;  %v4211_v22 = vsub.s32 %v2166_v18, %v3876_v9 }
 0x150   :  { %1947 = vadd.xlane.f32.xlu0 %v1731_v3  ;;  %3419 = vtanh.f32 %v1483_v26 }
 0x151   :  { %1825 = vadd.xlane.f32.xlu1 %v1670_v11  ;;  %v1182_v11 = vpop.f32.mrf.mxu1  ;;  %v3408_v55 = vpop.eup %3407  ;;  %3421 = vtanh.f32 %v1410_v12  ;;  %v4205_v12 = vsub.s32 %v4174_v41, %v3876_v9 }
 0x152   :  { %v1481_v15 = vadd.f32 %v3900_v46, %v1182_v11  ;;  %v3410_v20 = vpop.eup %3409  ;;  %v1678_v61 = vmul.f32 %v3408_v55, %v3922_v62  ;;  %v1476_v11 = vadd.f32 %v3900_v46, %v4101_v2 }
 0x153   :  { %v3182_v10 = vpop.f32.mrf.mxu1  ;;  %v1667_v30 = vmul.f32 %v3410_v20, %v3922_v62 }
 0x154   :  { %1823 = vadd.xlane.f32.xlu0 %v1669_v14  ;;  %3423 = vtanh.f32 %v1481_v15  ;;  %v1486_v31 = vadd.f32 %v3182_v10, %v3900_v46  ;;  %v4208_v14 = vsub.s32 %v2180_v40, %v3876_v9 }
 0x155   :  { %1959 = vadd.xlane.f32.xlu1 %v1737_v17  ;;  %v4151_v17 = vpop.f32.mrf.mxu0  ;;  %3425 = vtanh.f32 %v1475_v48  ;;  %v1195_v63 = vpop.f32.mrf.mxu1  ;;  %v2194_v48 = vadd.s32 4294967256, %v4174_v41 }
 0x156   :  { %3427 = vtanh.f32 %v1419_v59 }
 0x157   :  { %v4160_v27 = vpop.f32.mrf.mxu0  ;;  %3429 = vtanh.f32 %v1408_v45  ;;  %v3183_v32 = vpop.f32.mrf.mxu1 }
 0x158   :  { %1953 = vadd.xlane.f32.xlu0 %v1734_v23  ;;  %3431 = vtanh.f32 %v1486_v31  ;;  %v1487_v13 = vadd.f32 %v3183_v32, %v3900_v46  ;;  %v1412_v23 = vadd.f32 %v3893_v38, %v4113_v19 }
 0x159   :  { %1821 = vadd.xlane.f32.xlu1 %v1668_v54  ;;  %v3412_v54 = vpop.eup %3411  ;;  %v4169_v35 = vpop.f32.mrf.mxu0  ;;  %3433 = vtanh.f32 %v1411_v28  ;;  %v4235_v28 = vsub.s32 %v2194_v48, %v3876_v9 }
 0x15a   :  { %v3414_v29 = vpop.eup %3413  ;;  %v1676_v43 = vmul.f32 %v3412_v54, %v3922_v62  ;;  %v1198_v26 = vpop.f32.mrf.mxu1 }
 0x15b   :  { %v1732_v0 = vmul.f32 %v3414_v29, %v3922_v62  ;;  %v3119_v57 = vpop.f32.mrf.mxu0  ;;  %v1485_v20 = vadd.f32 %v3900_v46, %v1198_v26 }
 0x15c   :  { %1819 = vadd.xlane.f32.xlu0 %v1667_v30  ;;  %v3186_v59 = vpop.f32.mrf.mxu1  ;;  %v1423_v31 = vadd.f32 %v3119_v57, %v3893_v38 }
 0x15d   :  { %1957 = vadd.xlane.f32.xlu1 %v1736_v34  ;;  %v3416_v34 = vpop.eup %3415  ;;  %v4198_v25 = vpop.f32.mrf.mxu0 }
 0x15e   :  { %v3418_v8 = vpop.eup %3417  ;;  %v1681_v50 = vmul.f32 %v3416_v34, %v3922_v62 }
 0x15f   :  { %v3420_v53 = vpop.eup %3419  ;;  %v1735_v60 = vmul.f32 %v3418_v8, %v3922_v62  ;;  %v4222_v54 = vpop.f32.mrf.mxu0 }
 0x160   :  { %1949 = vadd.xlane.f32.xlu0 %v1732_v0  ;;  %v3422_v3 = vpop.eup %3421  ;;  %v4237_v8 = vpop.f32.mrf.mxu1 }
 0x161   :  { %1967 = vadd.xlane.f32.xlu1 %v1741_v44  ;;  %v1484_v44 = vadd.f32 %v3900_v46, %v1195_v63  ;;  %v3424_v21 = vpop.eup %3423  ;;  %v1673_v2 = vmul.f32 %v3422_v3, %v3922_v62 }
 0x162   :  { %v3426_v15 = vpop.eup %3425  ;;  %v1744_v10 = vmul.f32 %v3424_v21, %v3922_v62  ;;  %v4249_v3 = vpop.f32.mrf.mxu1 }
 0x163   :  { %3435 = vtanh.f32 %v1484_v44  ;;  %v1738_v30 = vmul.f32 %v3426_v15, %v3922_v62 }
 0x164   :  { %1955 = vadd.xlane.f32.xlu0 %v1735_v60  ;;  %v4268_v48 = vpop.f32.mrf.mxu1 }
 0x165   :  { %1839 = vadd.xlane.f32.xlu1 %v1677_v36  ;;  %v1409_v36 = vadd.f32 %v3891_v37, %v4094_v56  ;;  %v4201_v56 = vsub.s32 %v2173_v58, %v3876_v9 }
 0x167   :  { %3437 = vtanh.f32 %v1409_v36 }
 0x168   :  { %3439 = vtanh.f32 %v1487_v13  ;;  %1831 = vadd.xlane.f32.xlu0 %v1673_v2 }
 0x169   :  { %1969 = vadd.xlane.f32.xlu1 %v1742_v47  ;;  %v1746_v47 = vmul.f32 %v3420_v53, %v3922_v62  ;;  %3441 = vtanh.f32 %v1476_v11  ;;  %v955_v53 = vpop.f32.mrf.mxu0  ;;  %v1480_v11 = vadd.f32 %v3900_v46, %v4132_v6 }
 0x16a   :  { %3443 = vtanh.f32 %v1485_v20 }
 0x16b   :  { %3445 = vtanh.f32 %v1412_v23 }
 0x16c   :  { %1961 = vadd.xlane.f32.xlu0 %v1738_v30  ;;  %3447 = vtanh.f32 %v1423_v31  ;;  %v4278_v30 = vpop.f32.mrf.mxu1 }
 0x16d   :  { %1965 = vadd.xlane.f32.xlu1 %v1740_v16  ;;  %v4215_v16 = vsub.s32 %v2187_v4, %v3876_v9  ;;  %v1490_v4 = vadd.f32 %v3186_v59, %v3900_v46 }
 0x16e   :  { %v4155_v33 = vpop.xlane.xlu1 %1775 }
 0x171   :  { %1841 = vadd.xlane.f32.xlu1 %v1678_v61  ;;  %v4171_v5 = vpop.xlane.xlu0 %1771  ;;  %v3428_v61 = vpop.eup %3427 }
 0x172   :  { %v4165_v52 = vpop.xlane.xlu1 %1899  ;;  %v3430_v0 = vpop.eup %3429  ;;  %v1682_v32 = vmul.f32 %v3428_v61, %v3922_v62 }
 0x173   :  { %v2511_v19 = vrot.slane %v4165_v52, %v4205_v12  ;;  %v1671_v40 = vmul.f32 %v3430_v0, %v3922_v62 }
 0x175   :  { %1837 = vadd.xlane.f32.xlu1 %v1676_v43  ;;  %v4183_v7 = vpop.xlane.xlu0 %1903  ;;  %1827 = vadd.xlane.f32.xlu0 %v1671_v40 }
 0x176   :  { %v4179_v42 = vpop.xlane.xlu1 %1777  ;;  %v2520_v63 = vrot.slane %v4183_v7, %v4201_v56  ;;  %v1482_v7 = vadd.f32 %v4125_v39, %v3900_v46 }
 0x178   :  { %3449 = vtanh.f32 %v1482_v7 }
 0x179   :  { %1847 = vadd.xlane.f32.xlu1 %v1681_v50  ;;  %v1906_v37 = vpop.xlane.xlu0 %1905  ;;  %v3432_v50 = vpop.eup %3431  ;;  %3451 = vtanh.f32 %v1490_v4 }
 0x17a   :  { %v4191_v1 = vpop.xlane.xlu1 %1897  ;;  %v2525_v52 = vrot.slane %v1906_v37, %v4208_v14  ;;  %v3434_v60 = vpop.eup %3433  ;;  %v1749_v39 = vmul.f32 %v3432_v50, %v3922_v62  ;;  %v4261_v37 = vld [vmem:[%s4847_s6] ss:$0 sm:$0xff]  ;;  %3453 = vtanh.f32 %v1480_v11 }
 0x17b   :  { %v3436_v26 = vpop.eup %3435  ;;  %v1674_v15 = vmul.f32 %v4261_v37, %v3434_v60 }
 0x17c   :  { %v3438_v62 = vpop.eup %3437  ;;  %v1747_v23 = vmul.f32 %v4261_v37, %v3436_v26 }
 0x17d   :  { %1977 = vadd.xlane.f32.xlu1 %v1746_v47  ;;  %v1902_v45 = vpop.xlane.xlu0 %1901  ;;  %v3123_v47 = vpop.f32.mrf.mxu0  ;;  %1833 = vadd.xlane.f32.xlu0 %v1674_v15  ;;  %v1672_v61 = vmul.f32 %v4261_v37, %v3438_v62 }
 0x17e   :  { %v1908_v55 = vpop.xlane.xlu1 %1907  ;;  %v2515_v29 = vrot.slane %v1902_v45, %v4211_v22  ;;  %v3440_v20 = vpop.eup %3439 }
 0x17f   :  { %v2530_v43 = vrot.slane %v1908_v55, %v4215_v16  ;;  %v1421_v55 = vadd.f32 %v3893_v38, %v4198_v25  ;;  %v958_v6 = vpop.f32.mrf.mxu0  ;;  %v3442_v59 = vpop.eup %3441  ;;  %v1426_v25 = vadd.f32 %v4222_v54, %v3893_v38 }
 0x180   :  { %v2516_v44 = vsel %vm2171_vm3, %v2515_v29, %v2511_v19  ;;  %v1750_v19 = vmul.f32 %v4261_v37, %v3440_v20  ;;  %v3444_v29 = vpop.eup %3443 }
 0x181   :  { %1973 = vadd.xlane.f32.xlu1 %v1744_v10  ;;  %v2521_v57 = vsel %vm2178_vm4, %v2520_v63, %v2516_v44  ;;  %v1416_v10 = vadd.f32 %v3893_v38, %v4139_v24  ;;  %3455 = vtanh.f32 %v1421_v55  ;;  %v4281_v31 = vpop.f32.mrf.mxu0  ;;  %1829 = vadd.xlane.f32.xlu0 %v1672_v61  ;;  %v3565_v63 = vmov 0   ;;  %v3446_v54 = vpop.eup %3445 }
 0x182   :  { %v4232_v34 = vpop.xlane.xlu1 %1913  ;;  %v2526_v58 = vsel %vm2185_vm5, %v2525_v52, %v2521_v57  ;;  %3211 = vset.pattern.permute.xlu0 %v3565_v63  ;;  %v1417_v24 = vadd.f32 %v3893_v38, %v4151_v17  ;;  %v1424_v52 = vadd.f32 %v3893_v38, %v955_v53  ;;  %v4289_v44 = vpop.f32.mrf.mxu1  ;;  %v1422_v17 = vadd.f32 %v4160_v27, %v3893_v38 }
 0x183   :  { %v2531_v18 = vsel %vm2192_vm6, %v2530_v43, %v2526_v58  ;;  %3457 = vtanh.f32 %v1416_v10  ;;  %v1739_v43 = vmul.f32 %v4261_v37, %v3442_v59  ;;  %v3448_v50 = vpop.eup %3447  ;;  %v4292_v57 = vpop.f32.mrf.mxu0  ;;  %v1675_v7 = vmul.f32 %v4261_v37, %v3446_v54 }
 0x184   :  { %3459 = vtanh.f32 %v1426_v25  ;;  %v1427_v53 = vadd.f32 %v3123_v47, %v3893_v38  ;;  %v1420_v27 = vadd.f32 %v3893_v38, %v4169_v35  ;;  %v1425_v47 = vadd.f32 %v3893_v38, %v958_v6 }
 0x185   :  { %1849 = vadd.xlane.f32.xlu1 %v1682_v32  ;;  %v1748_v32 = vmul.f32 %v4261_v37, %v3444_v29  ;;  %1963 = vadd.xlane.f32.xlu0 %v1739_v43  ;;  %3461 = vtanh.f32 %v1417_v24  ;;  %v3450_v40 = vpop.eup %3449  ;;  %v3127_v4 = vpop.f32.mrf.mxu0  ;;  %v1488_v35 = vadd.f32 %v3900_v46, %v4237_v8  ;;  %v2201_v10 = vadd.s32 4294967248, %v4174_v41 }
 0x186   :  { %v1910_v36 = vpop.xlane.xlu1 %1909  ;;  %3463 = vtanh.f32 %v1424_v52  ;;  %v3452_v60 = vpop.eup %3451  ;;  %v2208_v25 = vadd.s32 4294967240, %v4174_v41  ;;  %v1489_v43 = vadd.f32 %v3900_v46, %v4268_v48 }
 0x187   :  { %v2535_v13 = vrot.slane %v1910_v36, %v4235_v28  ;;  %v1686_v36 = vmul.f32 %v4261_v37, %v3448_v50  ;;  %3465 = vtanh.f32 %v1422_v17  ;;  %v3454_v11 = vpop.eup %3453  ;;  %v1753_v62 = vmul.f32 %v4261_v37, %v3452_v60 }
 0x188   :  { %3467 = vtanh.f32 %v1427_v53  ;;  %v1743_v59 = vmul.f32 %v4261_v37, %v3454_v11  ;;  %v4333_v52 = vsub.s32 %v2201_v10, %v3876_v9 }
 0x189   :  { %v4254_v21 = vsel %vm2199_vm7, %v2535_v13, %v2531_v18  ;;  %1983 = vadd.xlane.f32.xlu1 %v1749_v39  ;;  %v3191_v18 = vpop.f32.mrf.mxu1  ;;  %1835 = vadd.xlane.f32.xlu0 %v1675_v7  ;;  %v4301_v13 = vpop.xlane.xlu0 %1891  ;;  %v1745_v39 = vmul.f32 %v4261_v37, %v3450_v40  ;;  %3469 = vtanh.f32 %v1420_v27  ;;  %v4339_v7 = vsub.s32 %v2208_v25, %v3876_v9 }
 0x18a   :  { %v4264_v2 = vpop.xlane.xlu1 %1785  ;;  %3471 = vtanh.f32 %v1425_v47  ;;  %v1495_v6 = vadd.f32 %v3191_v18, %v3902_v49 }
 0x18b   :  { %v1230_v15 = vpop.f32.mrf.mxu1  ;;  %3473 = vtanh.f32 %v1488_v35 }
 0x18c   :  { %3475 = vtanh.f32 %v1495_v6  ;;  %v1493_v17 = vadd.f32 %v3902_v49, %v1230_v15  ;;  %v1431_v15 = vadd.f32 %v3127_v4, %v3905_v51 }
 0x18d   :  { %1979 = vadd.xlane.f32.xlu1 %v1747_v23  ;;  %v4310_v23 = vpop.f32.mrf.mxu0  ;;  %1975 = vadd.xlane.f32.xlu0 %v1745_v39  ;;  %v4312_v20 = vpop.xlane.xlu0 %1893  ;;  %3477 = vtanh.f32 %v1489_v43  ;;  %v2177_v43 = vrot.slane %v4155_v33, %v4201_v56 }
 0x18e   :  { %v4274_v45 = vpop.xlane.xlu1 %1919  ;;  %v3456_v55 = vpop.eup %3455  ;;  %3479 = vtanh.f32 %v1493_v17 }
 0x18f   :  { %v4323_v63 = vpop.f32.mrf.mxu1  ;;  %v4325_v24 = vpop.f32.mrf.mxu0 }
 0x190   :  { %v3458_v38 = vpop.eup %3457 }
 0x191   :  { %1985 = vadd.xlane.f32.xlu1 %v1750_v19  ;;  %v1684_v19 = vmul.f32 %v4261_v37, %v3456_v55  ;;  %v3460_v29 = vpop.eup %3459  ;;  %1971 = vadd.xlane.f32.xlu0 %v1743_v59  ;;  %v4327_v8 = vpop.xlane.xlu0 %1895  ;;  %v1679_v54 = vmul.f32 %v4261_v37, %v3458_v38  ;;  %v1492_v38 = vadd.f32 %v3902_v49, %v4289_v44 }
 0x192   :  { %v4286_v0 = vpop.xlane.xlu1 %1781  ;;  %v3462_v50 = vpop.eup %3461  ;;  %v1689_v40 = vmul.f32 %v4261_v37, %v3460_v29  ;;  %v1429_v44 = vadd.f32 %v3905_v51, %v4310_v23  ;;  %v1430_v23 = vadd.f32 %v4281_v31, %v3905_v51 }
 0x193   :  { %v3464_v53 = vpop.eup %3463  ;;  %v4342_v18 = vpop.f32.mrf.mxu1  ;;  %v1680_v39 = vmul.f32 %v4261_v37, %v3462_v50 }
 0x194   :  { %v987_v48 = vpop.f32.mrf.mxu0  ;;  %v3466_v47 = vpop.eup %3465 }
 0x195   :  { %1981 = vadd.xlane.f32.xlu1 %v1748_v32  ;;  %1843 = vadd.xlane.f32.xlu0 %v1679_v54  ;;  %v1912_v60 = vpop.xlane.xlu0 %1911  ;;  %v3468_v55 = vpop.eup %3467  ;;  %v1432_v31 = vadd.f32 %v3905_v51, %v987_v48  ;;  %v1498_v48 = vadd.f32 %v4323_v63, %v3902_v49 }
 0x196   :  { %v4297_v58 = vpop.xlane.xlu1 %1921  ;;  %v2540_v27 = vrot.slane %v1912_v60, %v4333_v52  ;;  %v4354_v35 = vpop.f32.mrf.mxu1  ;;  %v1690_v54 = vmul.f32 %v4261_v37, %v3468_v55 }
 0x197   :  { %v4356_v59 = vpop.f32.mrf.mxu0 }
 0x198   :  { %v2541_v10 = vsel %vm2206_vm8, %v2540_v27, %v4254_v21  ;;  %v3470_v21 = vpop.eup %3469  ;;  %v1246_v17 = vpop.f32.mrf.mxu1 }
 0x199   :  { %1857 = vadd.xlane.f32.xlu1 %v1686_v36  ;;  %v1494_v36 = vadd.f32 %v4278_v30, %v3902_v49  ;;  %v1687_v30 = vmul.f32 %v4261_v37, %v3464_v53  ;;  %1845 = vadd.xlane.f32.xlu0 %v1680_v39  ;;  %v1774_v6 = vpop.xlane.xlu0 %1773  ;;  %v3472_v50 = vpop.eup %3471  ;;  %v2243_v53 = vadd.s32 4294967200, %v4174_v41  ;;  %v2236_v39 = vadd.s32 4294967208, %v4174_v41 }
 0x19a   :  { %v4306_v26 = vpop.xlane.xlu1 %1917  ;;  %v2170_v25 = vrot.slane %v1774_v6, %v4211_v22  ;;  %v3474_v55 = vpop.eup %3473  ;;  %v1497_v63 = vadd.f32 %v3902_v49, %v1246_v17  ;;  %v1435_v17 = vadd.f32 %v4356_v59, %v3905_v51 }
 0x19b   :  { %3481 = vtanh.f32 %v1494_v36  ;;  %v2229_v36 = vadd.s32 4294967216, %v4174_v41  ;;  %v3476_v6 = vpop.eup %3475 }
 0x19c   :  { %3483 = vtanh.f32 %v1431_v15 }
 0x19d   :  { %1991 = vadd.xlane.f32.xlu1 %v1753_v62  ;;  %v2545_v62 = vrot.slane %v4232_v34, %v4339_v7  ;;  %v2165_v34 = vrot.slane %v4171_v5, %v4205_v12  ;;  %v2184_v5 = vrot.slane %v4179_v42, %v4208_v14  ;;  %v1784_v27 = vpop.xlane.xlu0 %1783  ;;  %3485 = vtanh.f32 %v1492_v38 }
 0x19e   :  { %v4318_v61 = vpop.xlane.xlu1 %1793  ;;  %v1683_v42 = vmul.f32 %v4261_v37, %v3470_v21  ;;  %3487 = vtanh.f32 %v1429_v44  ;;  %v4400_v38 = vsub.s32 %v2243_v53, %v3876_v9  ;;  %v4404_v21 = vsub.s32 %v2229_v36, %v3876_v9 }
 0x19f   :  { %v4363_v4 = vsel %vm2213_vm9, %v2545_v62, %v2541_v10  ;;  %v2172_v60 = vsel %vm2171_vm3, %v2170_v25, %v2165_v34  ;;  %v2215_v62 = vadd.s32 4294967232, %v4174_v41  ;;  %v1688_v10 = vmul.f32 %v4261_v37, %v3472_v50  ;;  %v4395_v34 = vpop.f32.mrf.mxu1 }
 0x1a0   :  { %v2179_v33 = vsel %vm2178_vm4, %v2177_v43, %v2172_v60  ;;  %v1428_v44 = vadd.f32 %v3905_v51, %v4292_v57  ;;  %v4411_v43 = vsub.s32 %v2236_v39, %v3876_v9  ;;  %3489 = vtanh.f32 %v1430_v23  ;;  %v3478_v60 = vpop.eup %3477 }
 0x1a1   :  { %1853 = vadd.xlane.f32.xlu1 %v1684_v19  ;;  %v1685_v19 = vmul.f32 %v4261_v37, %v3466_v47  ;;  %v2222_v47 = vadd.s32 4294967224, %v4174_v41  ;;  %v2186_v15 = vsel %vm2185_vm5, %v2184_v5, %v2179_v33  ;;  %v1751_v53 = vmul.f32 %v4261_v37, %v3474_v55  ;;  %v4427_v23 = vpop.f32.mrf.mxu1 }
 0x1a2   :  { %v4335_v32 = vpop.xlane.xlu1 %1789  ;;  %v4419_v36 = vsub.s32 %v2215_v62, %v3876_v9  ;;  %3491 = vtanh.f32 %v1432_v31  ;;  %v2198_v33 = vrot.slane %v4286_v0, %v4235_v28  ;;  %v1758_v39 = vmul.f32 %v4261_v37, %v3476_v6 }
 0x1a3   :  { %1855 = vadd.xlane.f32.xlu0 %v1685_v19  ;;  %v2250_v19 = vadd.s32 4294967192, %v4174_v41  ;;  %v4414_v50 = vsub.s32 %v2222_v47, %v3876_v9  ;;  %v3480_v47 = vpop.eup %3479  ;;  %v2205_v55 = vrot.slane %v1784_v27, %v4333_v52  ;;  %3493 = vtanh.f32 %v1428_v44 }
 0x1a4   :  { %v2212_v0 = vrot.slane %v4264_v2, %v4339_v7  ;;  %v1752_v27 = vmul.f32 %v4261_v37, %v3478_v60  ;;  %3495 = vtanh.f32 %v1497_v63  ;;  %v2560_v60 = vrot.slane %v4274_v45, %v4404_v21 }
 0x1a5   :  { %1863 = vadd.xlane.f32.xlu1 %v1689_v40  ;;  %v4376_v40 = vpop.f32.mrf.mxu0  ;;  %v2555_v59 = vrot.slane %v4306_v26, %v4414_v50  ;;  %v4456_v26 = vsub.s32 %v2250_v19, %v3876_v9  ;;  %3497 = vtanh.f32 %v1498_v48  ;;  %v1496_v45 = vadd.f32 %v3902_v49, %v4342_v18 }
 0x1a6   :  { %v4348_v11 = vpop.xlane.xlu1 %1923  ;;  %3499 = vtanh.f32 %v1435_v17  ;;  %v2257_v18 = vadd.s32 4294967184, %v4174_v41 }
 0x1a7   :  { %v4397_v25 = vpop.f32.mrf.mxu0  ;;  %1851 = vadd.xlane.f32.xlu0 %v1683_v42  ;;  %v2570_v63 = vrot.slane %v4348_v11, %v4400_v38  ;;  %3501 = vtanh.f32 %v1496_v45 }
 0x1a8   :  { %v3482_v44 = vpop.eup %3481 }
 0x1a9   :  { %1859 = vadd.xlane.f32.xlu1 %v1687_v30  ;;  %v4429_v42 = vpop.f32.mrf.mxu0 }
 0x1aa   :  { %v4369_v29 = vpop.xlane.xlu1 %1799 }
 0x1ab   :  { %1987 = vadd.xlane.f32.xlu0 %v1751_v53  ;;  %v3484_v53 = vpop.eup %3483 }
 0x1ac   :  { %v3486_v19 = vpop.eup %3485 }
 0x1ad   :  { %1865 = vadd.xlane.f32.xlu1 %v1690_v54  ;;  %v1780_v54 = vpop.xlane.xlu0 %1779 }
 0x1ae   :  { %v4391_v30 = vpop.xlane.xlu1 %1925  ;;  %v2191_v5 = vrot.slane %v1780_v54, %v4215_v16 }
 0x1af   :  { %1989 = vadd.xlane.f32.xlu0 %v1752_v27  ;;  %v3488_v27 = vpop.eup %3487  ;;  %v2575_v17 = vrot.slane %v4391_v30, %v4456_v26  ;;  %v1499_v30 = vadd.f32 %v4354_v35, %v3902_v49 }
 0x1b0   :  { %v2193_v62 = vsel %vm2192_vm6, %v2191_v5, %v2186_v15  ;;  %v1756_v5 = vmul.f32 %v4261_v37, %v3480_v47  ;;  %v2565_v47 = vrot.slane %v4297_v58, %v4411_v43 }
 0x1b1   :  { %1861 = vadd.xlane.f32.xlu1 %v1688_v10  ;;  %v2200_v31 = vsel %vm2199_vm7, %v2198_v33, %v2193_v62  ;;  %v1916_v10 = vpop.xlane.xlu0 %1915  ;;  %v3199_v33 = vpop.f32.mrf.mxu1 }
 0x1b2   :  { %v4421_v57 = vpop.xlane.xlu1 %1801  ;;  %v2550_v6 = vrot.slane %v1916_v10, %v4419_v36  ;;  %v2207_v15 = vsel %vm2206_vm8, %v2205_v55, %v2200_v31  ;;  %v1503_v10 = vadd.f32 %v3199_v33, %v3902_v49  ;;  %v1755_v33 = vmul.f32 %v4261_v37, %v3486_v19 }
 0x1b3   :  { %v2214_v2 = vsel %vm2213_vm9, %v2212_v0, %v2207_v15  ;;  %v4470_v15 = vpop.f32.mrf.mxu1 }
 0x1b4   :  { %v2551_v55 = vsel %vm2220_vm10, %v2550_v6, %v4363_v4  ;;  %v1757_v4 = vmul.f32 %v4261_v37, %v3482_v44  ;;  %v1694_v6 = vmul.f32 %v4261_v37, %v3484_v53  ;;  %3503 = vtanh.f32 %v1503_v10 }
 0x1b5   :  { %2001 = vadd.xlane.f32.xlu1 %v1758_v39  ;;  %v4447_v39 = vpop.f32.mrf.mxu0  ;;  %v2556_v62 = vsel %vm2227_vm11, %v2555_v59, %v2551_v55  ;;  %v1792_v0 = vpop.xlane.xlu0 %1791  ;;  %v1434_v59 = vadd.f32 %v4325_v24, %v3905_v51  ;;  %v2226_v24 = vrot.slane %v4335_v32, %v4414_v50  ;;  %v2240_v10 = vrot.slane %v4318_v61, %v4411_v43 }
 0x1b6   :  { %v4441_v54 = vpop.xlane.xlu1 %1935  ;;  %v2561_v31 = vsel %vm2234_vm12, %v2560_v60, %v2556_v62  ;;  %1999 = vadd.xlane.f32.xlu0 %v1757_v4  ;;  %v3490_v55 = vpop.eup %3489  ;;  %v4491_v4 = vsub.s32 %v2257_v18, %v3876_v9  ;;  %v1491_v61 = vadd.f32 %v4249_v3, %v3900_v46 }
 0x1b7   :  { %v2566_v58 = vsel %vm2241_vm13, %v2565_v47, %v2561_v31  ;;  %v1006_v48 = vpop.f32.mrf.mxu0  ;;  %v1692_v47 = vmul.f32 %v4261_v37, %v3488_v27  ;;  %v3492_v62 = vpop.eup %3491  ;;  %v2233_v31 = vrot.slane %v1792_v0, %v4404_v21  ;;  %3505 = vtanh.f32 %v1434_v59 }
 0x1b8   :  { %v2571_v44 = vsel %vm2248_vm14, %v2570_v63, %v2566_v58  ;;  %v1437_v63 = vadd.f32 %v3905_v51, %v1006_v48  ;;  %v4488_v45 = vpop.f32.mrf.mxu1  ;;  %v3494_v35 = vpop.eup %3493  ;;  %v1693_v48 = vmul.f32 %v4261_v37, %v3490_v55 }
 0x1b9   :  { %1997 = vadd.xlane.f32.xlu1 %v1756_v5  ;;  %v1788_v5 = vpop.xlane.xlu0 %1787  ;;  %v1691_v46 = vmul.f32 %v4261_v37, %v3494_v35 }
 0x1ba   :  { %v4465_v11 = vpop.xlane.xlu1 %1797  ;;  %v2219_v53 = vrot.slane %v1788_v5, %v4419_v36  ;;  %1995 = vadd.xlane.f32.xlu0 %v1755_v33  ;;  %3507 = vtanh.f32 %v1437_v63  ;;  %v1695_v5 = vmul.f32 %v4261_v37, %v3492_v62  ;;  %v1502_v33 = vadd.f32 %v4395_v34, %v3902_v49 }
 0x1bb   :  { %3509 = vtanh.f32 %v1499_v30  ;;  %v2254_v30 = vrot.slane %v4465_v11, %v4456_v26  ;;  %v1433_v34 = vadd.f32 %v3905_v51, %v4376_v40 }
 0x1bc   :  { %v2221_v19 = vsel %vm2220_vm10, %v2219_v53, %v2214_v2  ;;  %3511 = vtanh.f32 %v1491_v61  ;;  %v1500_v61 = vadd.f32 %v3902_v49, %v4427_v23 }
 0x1bd   :  { %1873 = vadd.xlane.f32.xlu1 %v1694_v6  ;;  %v2228_v32 = vsel %vm2227_vm11, %v2226_v24, %v2221_v19  ;;  %v1928_v58 = vpop.xlane.xlu0 %1927  ;;  %v2576_v6 = vsel %vm2255_vm15, %v2575_v17, %v2571_v44  ;;  %v3496_v44 = vpop.eup %3495  ;;  %v2264_v24 = vadd.s32 4294967176, %v4174_v41  ;;  %3513 = vtanh.f32 %v1502_v33 }
 0x1be   :  { %v4480_v60 = vpop.xlane.xlu1 %1931  ;;  %v2580_v27 = vrot.slane %v1928_v58, %v4491_v4  ;;  %v2235_v0 = vsel %vm2234_vm12, %v2233_v31, %v2228_v32  ;;  %v1275_v17 = vpop.f32.mrf.mxu1  ;;  %1871 = vadd.xlane.f32.xlu0 %v1693_v48 }
 0x1bf   :  { %v2242_v18 = vsel %vm2241_vm13, %v2240_v10, %v2235_v0  ;;  %v3498_v55 = vpop.eup %3497  ;;  %v1504_v63 = vadd.f32 %v3902_v49, %v1275_v17  ;;  %v2261_v0 = vrot.slane %v4369_v29, %v4491_v4 }
 0x1c0   :  { %v4509_v59 = vsel %vm2262_vm0, %v2580_v27, %v2576_v6  ;;  %v3500_v62 = vpop.eup %3499  ;;  %v3203_v31 = vpop.f32.mrf.mxu1  ;;  %v1761_v32 = vmul.f32 %v4261_v37, %v3498_v55  ;;  %v4531_v27 = vsub.s32 %v2264_v24, %v3876_v9  ;;  %v2590_v55 = vrot.slane %v4480_v60, %v4205_v12 }
 0x1c1   :  { %1869 = vadd.xlane.f32.xlu1 %v1692_v47  ;;  %v4511_v53 = vpop.xlane.xlu0 %1929  ;;  %v1760_v47 = vmul.f32 %v4261_v37, %v3496_v44  ;;  %v3502_v6 = vpop.eup %3501  ;;  %3515 = vtanh.f32 %v1504_v63  ;;  %v1507_v35 = vadd.f32 %v3203_v31, %v3902_v49  ;;  %v1698_v11 = vmul.f32 %v4261_v37, %v3500_v62 }
 0x1c2   :  { %v4502_v2 = vpop.xlane.xlu1 %1807  ;;  %1867 = vadd.xlane.f32.xlu0 %v1691_v46  ;;  %v3504_v48 = vpop.eup %3503  ;;  %3517 = vtanh.f32 %v1433_v34  ;;  %v1759_v9 = vmul.f32 %v4261_v37, %v3502_v6  ;;  %v1438_v24 = vadd.f32 %v4397_v25, %v3905_v51 }
 0x1c3   :  { %3519 = vtanh.f32 %v1507_v35  ;;  %v1766_v23 = vmul.f32 %v4261_v37, %v3504_v48  ;;  %v1436_v35 = vadd.f32 %v3905_v51, %v4429_v42 }
 0x1c4   :  { %3521 = vtanh.f32 %v1500_v61 }
 0x1c5   :  { %1875 = vadd.xlane.f32.xlu1 %v1695_v5  ;;  %v1796_v19 = vpop.xlane.xlu0 %1795  ;;  %v2268_v5 = vrot.slane %v4421_v57, %v4531_v27  ;;  %3523 = vtanh.f32 %v1438_v24 }
 0x1c6   :  { %v4516_v3 = vpop.xlane.xlu1 %1803  ;;  %v2247_v10 = vrot.slane %v1796_v19, %v4400_v38  ;;  %2007 = vadd.xlane.f32.xlu0 %v1761_v32  ;;  %3525 = vtanh.f32 %v1436_v35 }
 0x1c8   :  { %v2249_v40 = vsel %vm2248_vm14, %v2247_v10, %v2242_v18  ;;  %v3506_v18 = vpop.eup %3505 }
 0x1c9   :  { %2005 = vadd.xlane.f32.xlu1 %v1760_v47  ;;  %v1938_v44 = vpop.xlane.xlu0 %1937  ;;  %v2256_v17 = vsel %vm2255_vm15, %v2254_v30, %v2249_v40  ;;  %v3508_v57 = vpop.eup %3507  ;;  %v1697_v62 = vmul.f32 %v4261_v37, %v3506_v18  ;;  %v2599_v30 = vrot.slane %v4441_v54, %v4201_v56 }
 0x1ca   :  { %v4527_v58 = vpop.xlane.xlu1 %1815  ;;  %v2263_v33 = vsel %vm2262_vm0, %v2261_v0, %v2256_v17  ;;  %2003 = vadd.xlane.f32.xlu0 %v1759_v9  ;;  %v3510_v19 = vpop.eup %3509  ;;  %v1700_v34 = vmul.f32 %v4261_v37, %v3508_v57  ;;  %v2604_v60 = vrot.slane %v1938_v44, %v4208_v14  ;;  %v1501_v44 = vadd.f32 %v3902_v49, %v4470_v15 }
 0x1cb   :  { %v4547_v46 = vsel %vm2269_vm1, %v2268_v5, %v2263_v33  ;;  %v3512_v10 = vpop.eup %3511 }
 0x1cc   :  { %v3514_v0 = vpop.eup %3513  ;;  %v1754_v40 = vmul.f32 %v4261_v37, %v3512_v10  ;;  %3527 = vtanh.f32 %v1501_v44 }
 0x1cd   :  { %1881 = vadd.xlane.f32.xlu1 %v1698_v11  ;;  %v1934_v63 = vpop.xlane.xlu0 %1933  ;;  %v1762_v11 = vmul.f32 %v4261_v37, %v3510_v19  ;;  %v1765_v17 = vmul.f32 %v4261_v37, %v3514_v0 }
 0x1ce   :  { %v4544_v29 = vpop.xlane.xlu1 %1945  ;;  %v2594_v47 = vrot.slane %v1934_v63, %v4211_v22  ;;  %1879 = vadd.xlane.f32.xlu0 %v1697_v62  ;;  %v3516_v61 = vpop.eup %3515  ;;  %v2283_v62 = vrot.slane %v4502_v2, %v4201_v56 }
 0x1cf   :  { %v3518_v42 = vpop.eup %3517  ;;  %v1767_v33 = vmul.f32 %v4261_v37, %v3516_v61 }
 0x1d0   :  { %v2595_v32 = vsel %vm2171_vm3, %v2594_v47, %v2590_v55  ;;  %v3520_v18 = vpop.eup %3519  ;;  %v1439_v55 = vadd.f32 %v4447_v39, %v3905_v51  ;;  %v1696_v63 = vmul.f32 %v4261_v37, %v3518_v42  ;;  %v1506_v51 = vadd.f32 %v4488_v45, %v3902_v49 }
 0x1d1   :  { %2017 = vadd.xlane.f32.xlu1 %v1766_v23  ;;  %v1810_v6 = vpop.xlane.xlu0 %1809  ;;  %v2600_v25 = vsel %vm2178_vm4, %v2599_v30, %v2595_v32  ;;  %v2274_v23 = vrot.slane %v4516_v3, %v4205_v12  ;;  %v3522_v47 = vpop.eup %3521  ;;  %v1770_v19 = vmul.f32 %v4261_v37, %v3520_v18  ;;  %v2303_v18 = vrot.slane %v4527_v58, %v4333_v52 }
 0x1d2   :  { %v4556_v31 = vpop.xlane.xlu1 %1941  ;;  %v2605_v54 = vsel %vm2185_vm5, %v2604_v60, %v2600_v25  ;;  %2009 = vadd.xlane.f32.xlu0 %v1762_v11  ;;  %v2288_v3 = vrot.slane %v1810_v6, %v4208_v14  ;;  %3529 = vtanh.f32 %v1439_v55  ;;  %v1278_v60 = vpop.f32.mrf.mxu1  ;;  %v1763_v32 = vmul.f32 %v4261_v37, %v3522_v47 }
 0x1d3   :  { %v2614_v10 = vrot.slane %v4556_v31, %v4235_v28  ;;  %v3524_v35 = vpop.eup %3523  ;;  %v1505_v0 = vadd.f32 %v3902_v49, %v1278_v60  ;;  %v2624_v31 = vrot.slane %v4544_v29, %v4339_v7  ;;  %3531 = vtanh.f32 %v1506_v51 }
 0x1d4   :  { %v1701_v42 = vmul.f32 %v4261_v37, %v3524_v35 }
 0x1d5   :  { %1885 = vadd.xlane.f32.xlu1 %v1700_v34  ;;  %v1944_v5 = vpop.xlane.xlu0 %1943  ;;  %3533 = vtanh.f32 %v1505_v0 }
 0x1d6   :  { %v1814_v48 = vpop.xlane.xlu1 %1813  ;;  %2015 = vadd.xlane.f32.xlu0 %v1765_v17  ;;  %v2619_v11 = vrot.slane %v1944_v5, %v4333_v52 }
 0x1d7   :  { %v2298_v44 = vrot.slane %v1814_v48, %v4235_v28 }
 0x1d9   :  { %1993 = vadd.xlane.f32.xlu1 %v1754_v40  ;;  %v1806_v57 = vpop.xlane.xlu0 %1805 }
 0x1da   :  { %v4572_v9 = vpop.xlane.xlu1 %1825  ;;  %v2278_v15 = vrot.slane %v1806_v57, %v4211_v22  ;;  %1877 = vadd.xlane.f32.xlu0 %v1696_v63 }
 0x1dc   :  { %v2279_v30 = vsel %vm2171_vm3, %v2278_v15, %v2274_v23 }
 0x1dd   :  { %2019 = vadd.xlane.f32.xlu1 %v1767_v33  ;;  %v2284_v39 = vsel %vm2178_vm4, %v2283_v62, %v2279_v30  ;;  %v1940_v34 = vpop.xlane.xlu0 %1939 }
 0x1de   :  { %v4581_v24 = vpop.xlane.xlu1 %1959  ;;  %v2609_v2 = vrot.slane %v1940_v34, %v4215_v16  ;;  %v2289_v6 = vsel %vm2185_vm5, %v2288_v3, %v2284_v39  ;;  %2011 = vadd.xlane.f32.xlu0 %v1763_v32 }
 0x1e0   :  { %v2610_v45 = vsel %vm2192_vm6, %v2609_v2, %v2605_v54  ;;  %v3526_v54 = vpop.eup %3525 }
 0x1e1   :  { %2025 = vadd.xlane.f32.xlu1 %v1770_v19  ;;  %v1812_v40 = vpop.xlane.xlu0 %1811  ;;  %v2615_v61 = vsel %vm2199_vm7, %v2614_v10, %v2610_v45  ;;  %v1699_v55 = vmul.f32 %v4261_v37, %v3526_v54  ;;  %v3528_v47 = vpop.eup %3527  ;;  %v2328_v54 = vrot.slane %v4572_v9, %v4411_v43 }
 0x1e2   :  { %v1822_v25 = vpop.xlane.xlu1 %1821  ;;  %v2293_v17 = vrot.slane %v1812_v40, %v4215_v16  ;;  %v2620_v5 = vsel %vm2206_vm8, %v2619_v11, %v2615_v61  ;;  %1887 = vadd.xlane.f32.xlu0 %v1701_v42  ;;  %v1764_v19 = vmul.f32 %v4261_v37, %v3528_v47  ;;  %v3530_v30 = vpop.eup %3529 }
 0x1e3   :  { %v2625_v49 = vsel %vm2213_vm9, %v2624_v31, %v2620_v5  ;;  %v1702_v34 = vmul.f32 %v4261_v37, %v3530_v30  ;;  %v3532_v60 = vpop.eup %3531 }
 0x1e4   :  { %v2294_v29 = vsel %vm2192_vm6, %v2293_v17, %v2289_v6  ;;  %v1769_v6 = vmul.f32 %v4261_v37, %v3532_v60  ;;  %v3534_v11 = vpop.eup %3533  ;;  %v2318_v17 = vrot.slane %v1822_v25, %v4414_v50 }
 0x1e5   :  { %v1818_v23 = vpop.xlane.xlu0 %1817  ;;  %v2299_v48 = vsel %vm2199_vm7, %v2298_v44, %v2294_v29  ;;  %v1768_v0 = vmul.f32 %v4261_v37, %v3534_v11 }
 0x1e6   :  { %v4606_v33 = vpop.xlane.xlu1 %1957  ;;  %v2308_v57 = vrot.slane %v1818_v23, %v4339_v7  ;;  %v2304_v15 = vsel %vm2206_vm8, %v2303_v18, %v2299_v48  ;;  %1883 = vadd.xlane.f32.xlu0 %v1699_v55 }
 0x1e7   :  { %v2654_v30 = vrot.slane %v4606_v33, %v4456_v26  ;;  %v2029_v33 = vld [vmem:[%s4843_s2] sm:$0xff]  ;;  %s3566_s2 = smov [#allocation2]  }
 0x1e8   :  { %v2309_v62 = vsel %vm2213_vm9, %v2308_v57, %v2304_v15  ;;  %s2856_s11 = sshll.u32 %s3566_s2, 4  ;;  %s2857_s11 = int_to_ptr.vmem [resolvable:$true] %s2856_s11 }
 0x1e9   :  { %v1952_v58 = vpop.xlane.xlu0 %1951  ;;  %s3540_s12 = scalar_lea.vmem %s2857_s11, 128  ;;  %p3545_p1 = scmp.lt.s32.totalorder %s2857_s11, %s2857_s11 }
 0x1ea   :  { %v4616_v63 = vpop.xlane.xlu1 %1967  ;;  %2013 = vadd.xlane.f32.xlu0 %v1764_v19  ;;  %v2639_v48 = vrot.slane %v1952_v58, %v4404_v21  ;;  %v2659_v58 = vrot.slane %v4581_v24, %v4491_v4  ;;  %p3541_p0 = scmp.ne.s32.totalorder %s2857_s11, %s3540_s12  ;;  %p3546_p2 = scmp.lt.s32.totalorder %s3540_s12, %s3540_s12 }
 0x1ec   :  { %p3547_p3 = por %p3546_p2, %p3545_p1 }
 0x1ed   :  { %v1948_v51 = vpop.xlane.xlu0 %1947 }
 0x1ee   :  { %v4620_v3 = vpop.xlane.xlu1 %1839  ;;  %v2629_v39 = vrot.slane %v1948_v51, %v4419_v36  ;;  %1889 = vadd.xlane.f32.xlu0 %v1702_v34  ;;  %p3548_p4 = pnand %p3547_p3, %p3541_p0 }
 0x1f0   :  { %v2630_v2 = vsel %vm2220_vm10, %v2629_v39, %v2625_v49 }
 0x1f1   :  { %v1824_v32 = vpop.xlane.xlu0 %1823 }
 0x1f2   :  { %v4624_v10 = vpop.xlane.xlu1 %1969  ;;  %2023 = vadd.xlane.f32.xlu0 %v1769_v6  ;;  %v2323_v42 = vrot.slane %v1824_v32, %v4404_v21 }
 0x1f5   :  { %v1954_v45 = vpop.xlane.xlu0 %1953 }
 0x1f6   :  { %v4628_v35 = vpop.xlane.xlu1 %1965  ;;  %2021 = vadd.xlane.f32.xlu0 %v1768_v0  ;;  %v2644_v57 = vrot.slane %v1954_v45, %v4411_v43 }
 0x1f9   :  { %v1820_v31 = vpop.xlane.xlu0 %1819 }
 0x1fa   :  { %v4631_v40 = vpop.xlane.xlu1 %1841  ;;  %v2313_v61 = vrot.slane %v1820_v31, %v4419_v36 }
 0x1fc   :  { %v2314_v5 = vsel %vm2220_vm10, %v2313_v61, %v2309_v62 }
 0x1fd   :  { %v2319_v49 = vsel %vm2227_vm11, %v2318_v17, %v2314_v5  ;;  %v1950_v37 = vpop.xlane.xlu0 %1949 }
 0x1fe   :  { %v4634_v44 = vpop.xlane.xlu1 %1837  ;;  %v2634_v18 = vrot.slane %v1950_v37, %v4414_v50  ;;  %v2324_v29 = vsel %vm2234_vm12, %v2323_v42, %v2319_v49 }
 0x1ff   :  { %v2329_v25 = vsel %vm2241_vm13, %v2328_v54, %v2324_v29 }
 0x200   :  { %v2635_v55 = vsel %vm2227_vm11, %v2634_v18, %v2630_v2 }
 0x201   :  { %v2640_v15 = vsel %vm2234_vm12, %v2639_v48, %v2635_v55  ;;  %v1956_v9 = vpop.xlane.xlu0 %1955  ;;  %v2673_v55 = vrot.slane %v4628_v35, %v4211_v22  ;;  %v2357_v35 = vrot.slane %v4634_v44, %v4211_v22 }
 0x202   :  { %v4644_v23 = vpop.xlane.xlu1 %1847  ;;  %v2645_v47 = vsel %vm2241_vm13, %v2644_v57, %v2640_v15  ;;  %v2649_v62 = vrot.slane %v1956_v9, %v4400_v38 }
 0x204   :  { %v2650_v51 = vsel %vm2248_vm14, %v2649_v62, %v2645_v47  ;;  %v2678_v47 = vrot.slane %v4616_v63, %v4201_v56  ;;  %v2367_v63 = vrot.slane %v4631_v40, %v4208_v14 }
 0x205   :  { %v2655_v39 = vsel %vm2255_vm15, %v2654_v30, %v2650_v51  ;;  %v1832_v34 = vpop.xlane.xlu0 %1831  ;;  %v2683_v30 = vrot.slane %v4624_v10, %v4208_v14 }
 0x206   :  { %v4653_v19 = vpop.xlane.xlu1 %1977  ;;  %v2660_v60 = vsel %vm2262_vm0, %v2659_v58, %v2655_v39  ;;  %v2343_v37 = vrot.slane %v1832_v34, %v4491_v4 }
 0x209   :  { %v1962_v32 = vpop.xlane.xlu0 %1961 }
 0x20a   :  { %v1974_v2 = vpop.xlane.xlu1 %1973  ;;  %v2664_v6 = vrot.slane %v1962_v32, %v4531_v27 }
 0x20c   :  { %v4669_v45 = vsel %vm2269_vm1, %v2664_v6, %v2660_v60  ;;  %2031 = vperm.xlu0 %3211, %v2029_v33  }
 0x20d   :  { %v1828_v24 = vpop.xlane.xlu0 %1827 }
 0x20e   :  { %v4663_v11 = vpop.xlane.xlu1 %1849  ;;  %v2333_v0 = vrot.slane %v1828_v24, %v4400_v38 }
 0x210   :  { %v2334_v61 = vsel %vm2248_vm14, %v2333_v0, %v2329_v25 }
 0x211   :  { %v1834_v17 = vpop.xlane.xlu0 %1833 }
 0x212   :  { %v1984_v31 = vpop.xlane.xlu1 %1983  ;;  %v2348_v18 = vrot.slane %v1834_v17, %v4531_v27 }
 0x215   :  { %v1830_v5 = vpop.xlane.xlu0 %1829 }
 0x216   :  { %v1980_v42 = vpop.xlane.xlu1 %1979  ;;  %v2338_v54 = vrot.slane %v1830_v5, %v4456_v26  ;;  %v2693_v5 = vrot.slane %v1974_v2, %v4235_v28 }
 0x217   :  { %v2708_v40 = vrot.slane %v1980_v42, %v4419_v36 }
 0x218   :  { %v2339_v29 = vsel %vm2255_vm15, %v2338_v54, %v2334_v61 }
 0x219   :  { %v2344_v48 = vsel %vm2262_vm0, %v2343_v37, %v2339_v29  ;;  %v1964_v57 = vpop.xlane.xlu0 %1963  ;;  %v2703_v37 = vrot.slane %v4653_v19, %v4339_v7 }
 0x21a   :  { %v1986_v49 = vpop.xlane.xlu1 %1985  ;;  %v2349_v25 = vsel %vm2269_vm1, %v2348_v18, %v2344_v48  ;;  %v2669_v15 = vrot.slane %v1964_v57, %v4205_v12 }
 0x21b   :  { %v4685_v62 = vsel %vm2824_vm2, %v2349_v25, %v4547_v46  ;;  %v2362_v46 = vrot.slane %v4620_v3, %v4201_v56  ;;  %v2723_v19 = vrot.slane %v1986_v49, %v4411_v43  ;;  %vm2826_vm2 = vcmask 1042434  }
 0x21c   :  { %v2674_v58 = vsel %vm2171_vm3, %v2673_v55, %v2669_v15  ;;  %v2718_v15 = vrot.slane %v1984_v31, %v4404_v21  ;;  %v2387_v31 = vrot.slane %v4663_v11, %v4339_v7 }
 0x21d   :  { %v2679_v51 = vsel %vm2178_vm4, %v2678_v47, %v2674_v58  ;;  %v1836_v39 = vpop.xlane.xlu0 %1835 }
 0x21e   :  { %v1982_v9 = vpop.xlane.xlu1 %1981  ;;  %v2353_v34 = vrot.slane %v1836_v39, %v4205_v12  ;;  %v2684_v60 = vsel %vm2185_vm5, %v2683_v30, %v2679_v51 }
 0x21f   :  { %v2713_v48 = vrot.slane %v1982_v9, %v4414_v50 }
 0x220   :  { %v2358_v10 = vsel %vm2171_vm3, %v2357_v35, %v2353_v34  ;;  %v2382_v35 = vrot.slane %v4644_v23, %v4333_v52 }
 0x221   :  { %v2363_v6 = vsel %vm2178_vm4, %v2362_v46, %v2358_v10  ;;  %v1976_v33 = vpop.xlane.xlu0 %1975 }
 0x222   :  { %v1858_v32 = vpop.xlane.xlu1 %1857  ;;  %v2368_v24 = vsel %vm2185_vm5, %v2367_v63, %v2363_v6  ;;  %v2698_v3 = vrot.slane %v1976_v33, %v4333_v52 }
 0x225   :  { %v1972_v44 = vpop.xlane.xlu0 %1971 }
 0x226   :  { %v4702_v0 = vpop.xlane.xlu1 %1991  ;;  %v2688_v61 = vrot.slane %v1972_v44, %v4215_v16 }
 0x228   :  { %v2689_v54 = vsel %vm2192_vm6, %v2688_v61, %v2684_v60 }
 0x229   :  { %v2694_v18 = vsel %vm2199_vm7, %v2693_v5, %v2689_v54  ;;  %v1844_v29 = vpop.xlane.xlu0 %1843  ;;  %v2407_v5 = vrot.slane %v1858_v32, %v4411_v43 }
 0x22a   :  { %v1854_v17 = vpop.xlane.xlu1 %1853  ;;  %v2372_v57 = vrot.slane %v1844_v29, %v4215_v16  ;;  %v2699_v55 = vsel %vm2206_vm8, %v2698_v3, %v2694_v18 }
 0x22b   :  { %v2704_v2 = vsel %vm2213_vm9, %v2703_v37, %v2699_v55  ;;  %v2397_v33 = vrot.slane %v1854_v17, %v4414_v50 }
 0x22c   :  { %v2373_v47 = vsel %vm2192_vm6, %v2372_v57, %v2368_v24  ;;  %v2709_v42 = vsel %vm2220_vm10, %v2708_v40, %v2704_v2 }
 0x22d   :  { %v1846_v30 = vpop.xlane.xlu0 %1845  ;;  %v2714_v58 = vsel %vm2227_vm11, %v2713_v48, %v2709_v42  ;;  %v2738_v42 = vrot.slane %v4702_v0, %v4491_v4 }
 0x22e   :  { %v1864_v25 = vpop.xlane.xlu1 %1863  ;;  %v2377_v9 = vrot.slane %v1846_v30, %v4235_v28  ;;  %v2719_v51 = vsel %vm2234_vm12, %v2718_v15, %v2714_v58 }
 0x22f   :  { %v2724_v34 = vsel %vm2241_vm13, %v2723_v19, %v2719_v51  ;;  %v2422_v48 = vrot.slane %v1864_v25, %v4491_v4 }
 0x230   :  { %v2378_v60 = vsel %vm2199_vm7, %v2377_v9, %v2373_v47 }
 0x231   :  { %v2383_v46 = vsel %vm2206_vm8, %v2382_v35, %v2378_v60  ;;  %v1856_v49 = vpop.xlane.xlu0 %1855 }
 0x232   :  { %v1860_v39 = vpop.xlane.xlu1 %1859  ;;  %v2388_v63 = vsel %vm2213_vm9, %v2387_v31, %v2383_v46  ;;  %v2402_v23 = vrot.slane %v1856_v49, %v4404_v21 }
 0x233   :  { %v2412_v11 = vrot.slane %v1860_v39, %v4400_v38 }
 0x235   :  { %v1852_v6 = vpop.xlane.xlu0 %1851 }
 0x236   :  { %v1866_v10 = vpop.xlane.xlu1 %1865  ;;  %v2392_v24 = vrot.slane %v1852_v6, %v4419_v36 }
 0x237   :  { %v2427_v32 = vrot.slane %v1866_v10, %v4531_v27 }
 0x238   :  { %v2393_v61 = vsel %vm2220_vm10, %v2392_v24, %v2388_v63 }
 0x239   :  { %v1988_v3 = vpop.xlane.xlu0 %1987  ;;  %v2398_v54 = vsel %vm2227_vm11, %v2397_v33, %v2393_v61 }
 0x23a   :  { %v1862_v44 = vpop.xlane.xlu1 %1861  ;;  %v2728_v37 = vrot.slane %v1988_v3, %v4400_v38  ;;  %v2403_v17 = vsel %vm2234_vm12, %v2402_v23, %v2398_v54 }
 0x23b   :  { %v2417_v40 = vrot.slane %v1862_v44, %v4456_v26  ;;  %v2408_v18 = vsel %vm2241_vm13, %v2407_v5, %v2403_v17 }
 0x23c   :  { %v2729_v29 = vsel %vm2248_vm14, %v2728_v37, %v2724_v34  ;;  %v2413_v57 = vsel %vm2248_vm14, %v2412_v11, %v2408_v18 }
 0x23d   :  { %v1990_v55 = vpop.xlane.xlu0 %1989  ;;  %v2418_v2 = vsel %vm2255_vm15, %v2417_v40, %v2413_v57 }
 0x23e   :  { %v2733_v15 = vrot.slane %v1990_v55, %v4456_v26  ;;  %v2423_v47 = vsel %vm2262_vm0, %v2422_v48, %v2418_v2  ;;  %v2002_v58 = vpop.xlane.xlu1 %2001 }
 0x23f   :  { %v2428_v30 = vsel %vm2269_vm1, %v2427_v32, %v2423_v47  ;;  %v2762_v32 = vrot.slane %v2002_v58, %v4208_v14 }
 0x240   :  { %v2734_v19 = vsel %vm2255_vm15, %v2733_v15, %v2729_v29  ;;  %v4754_v25 = vsel %vm2826_vm2, %v2428_v30, %v4685_v62 }
 0x241   :  { %v2000_v9 = vpop.xlane.xlu0 %1999  ;;  %v4757_v51 = vsel %vm2262_vm0, %v2738_v42, %v2734_v19 }
 0x242   :  { %v1998_v35 = vpop.xlane.xlu1 %1997  ;;  %v2757_v18 = vrot.slane %v2000_v9, %v4201_v56 }
 0x243   :  { %v2752_v23 = vrot.slane %v1998_v35, %v4211_v22 }
 0x245   :  { %v1996_v39 = vpop.xlane.xlu0 %1995 }
 0x246   :  { %v1874_v31 = vpop.xlane.xlu1 %1873  ;;  %v2748_v54 = vrot.slane %v1996_v39, %v4205_v12 }
 0x247   :  { %v2446_v17 = vrot.slane %v1874_v31, %v4208_v14 }
 0x248   :  { %v2753_v37 = vsel %vm2171_vm3, %v2752_v23, %v2748_v54 }
 0x249   :  { %v1872_v34 = vpop.xlane.xlu0 %1871  ;;  %v2758_v55 = vsel %vm2178_vm4, %v2757_v18, %v2753_v37  ;;  %v2501_v37 = vrot.slane %v4327_v8, %v4491_v4 }
 0x24a   :  { %v1870_v49 = vpop.xlane.xlu1 %1869  ;;  %v2441_v5 = vrot.slane %v1872_v34, %v4201_v56  ;;  %v2763_v47 = vsel %vm2185_vm5, %v2762_v32, %v2758_v55 }
 0x24b   :  { %v2436_v62 = vrot.slane %v1870_v49, %v4211_v22 }
 0x24d   :  { %v1868_v60 = vpop.xlane.xlu0 %1867 }
 0x24e   :  { %v1876_v63 = vpop.xlane.xlu1 %1875  ;;  %v2432_v44 = vrot.slane %v1868_v60, %v4205_v12 }
 0x24f   :  { %v2451_v29 = vrot.slane %v1876_v63, %v4215_v16 }
 0x250   :  { %v2437_v61 = vsel %vm2171_vm3, %v2436_v62, %v2432_v44  ;;  %vm2828_vm3 = vcmask 1043459  }
 0x251   :  { %v2008_v46 = vpop.xlane.xlu0 %2007  ;;  %v2442_v40 = vsel %vm2178_vm4, %v2441_v5, %v2437_v61  ;;  %v2491_v5 = vrot.slane %v4301_v13, %v4400_v38  ;;  %vm2830_vm4 = vcmask 1044484  }
 0x252   :  { %v2006_v33 = vpop.xlane.xlu1 %2005  ;;  %v2447_v22 = vsel %vm2185_vm5, %v2446_v17, %v2442_v40  ;;  %v2777_v31 = vrot.slane %v2008_v46, %v4333_v52  ;;  %v2506_v40 = vrot.slane %v4191_v1, %v4531_v27  ;;  %vm2832_vm5 = vcmask 1045509  }
 0x253   :  { %v2452_v2 = vsel %vm2192_vm6, %v2451_v29, %v2447_v22  ;;  %v2772_v42 = vrot.slane %v2006_v33, %v4235_v28 }
 0x255   :  { %v2004_v0 = vpop.xlane.xlu0 %2003 }
 0x256   :  { %v1882_v11 = vpop.xlane.xlu1 %1881  ;;  %v2767_v56 = vrot.slane %v2004_v0, %v4215_v16 }
 0x257   :  { %v2466_v19 = vrot.slane %v1882_v11, %v4339_v7 }
 0x258   :  { %v2768_v14 = vsel %vm2192_vm6, %v2767_v56, %v2763_v47  ;;  %vm2834_vm6 = vcmask 1046534  }
 0x259   :  { %v1880_v10 = vpop.xlane.xlu0 %1879  ;;  %v2773_v35 = vsel %vm2199_vm7, %v2772_v42, %v2768_v14 }
 0x25a   :  { %v2018_v57 = vpop.xlane.xlu1 %2017  ;;  %v2461_v39 = vrot.slane %v1880_v10, %v4333_v52  ;;  %v2778_v49 = vsel %vm2206_vm8, %v2777_v31, %v2773_v35 }
 0x25d   :  { %v2010_v6 = vpop.xlane.xlu0 %2009 }
 0x25e   :  { %v1886_v9 = vpop.xlane.xlu1 %1885  ;;  %v2782_v10 = vrot.slane %v2010_v6, %v4339_v7 }
 0x25f   :  { %v2476_v60 = vrot.slane %v1886_v9, %v4414_v50 }
 0x260   :  { %v2783_v44 = vsel %vm2213_vm9, %v2782_v10, %v2778_v49 }
 0x261   :  { %v4760_v24 = vpop.xlane.xlu0 %2015 }
 0x262   :  { %v1994_v33 = vpop.xlane.xlu1 %1993  ;;  %v2797_v13 = vrot.slane %v4760_v24, %v4404_v21 }
 0x263   :  { %v2743_v1 = vrot.slane %v1994_v33, %v4531_v27 }
 0x265   :  { %v1878_v3 = vpop.xlane.xlu0 %1877 }
 0x266   :  { %v2456_v12 = vrot.slane %v1878_v3, %v4235_v28 }
 0x268   :  { %v2457_v30 = vsel %vm2199_vm7, %v2456_v12, %v2452_v2  ;;  %vm2836_vm7 = vcmask 1047559  }
 0x269   :  { %v2012_v48 = vpop.xlane.xlu0 %2011  ;;  %v2462_v28 = vsel %vm2206_vm8, %v2461_v39, %v2457_v30 }
 0x26a   :  { %v2467_v16 = vsel %vm2213_vm9, %v2466_v19, %v2462_v28  ;;  %v2787_v62 = vrot.slane %v2012_v48, %v4419_v36 }
 0x26c   :  { %v2788_v3 = vsel %vm2220_vm10, %v2787_v62, %v2783_v44 }
 0x26d   :  { %v1888_v15 = vpop.xlane.xlu0 %1887 }
 0x26e   :  { %v2481_v23 = vrot.slane %v1888_v15, %v4404_v21  ;;  %v2802_v21 = vrot.slane %v2018_v57, %v4411_v43 }
 0x271   :  { %v1884_v58 = vpop.xlane.xlu0 %1883 }
 0x272   :  { %v2471_v34 = vrot.slane %v1884_v58, %v4419_v36  ;;  %v2496_v36 = vrot.slane %v4312_v20, %v4456_v26  ;;  %v2585_v20 = vrot.slane %v4511_v53, %v4531_v27 }
 0x274   :  { %v2472_v0 = vsel %vm2220_vm10, %v2471_v34, %v2467_v16  ;;  %v2586_v53 = vsel %vm2269_vm1, %v2585_v20, %v4509_v59 }
 0x275   :  { %v2014_v63 = vpop.xlane.xlu0 %2013  ;;  %v2477_v52 = vsel %vm2227_vm11, %v2476_v60, %v2472_v0 }
 0x276   :  { %v2792_v46 = vrot.slane %v2014_v63, %v4414_v50  ;;  %v2482_v7 = vsel %vm2234_vm12, %v2481_v23, %v2477_v52  ;;  %v2020_v50 = vpop.xlane.xlu1 %2019 }
 0x277   :  { %v2807_v8 = vrot.slane %v2020_v50, %v4400_v38  ;;  %v2744_v38 = vsel %vm2269_vm1, %v2743_v1, %v4757_v51 }
 0x278   :  { %v2793_v6 = vsel %vm2227_vm11, %v2792_v46, %v2788_v3 }
 0x279   :  { %v1890_v61 = vpop.xlane.xlu0 %1889  ;;  %v2798_v48 = vsel %vm2234_vm12, %v2797_v13, %v2793_v6 }
 0x27a   :  { %v2486_v11 = vrot.slane %v1890_v61, %v4411_v43  ;;  %v2803_v12 = vsel %vm2241_vm13, %v2802_v21, %v2798_v48  ;;  %v2026_v2 = vpop.xlane.xlu1 %2025 }
 0x27b   :  { %v2808_v43 = vsel %vm2248_vm14, %v2807_v8, %v2803_v12 }
 0x27c   :  { %v2487_v54 = vsel %vm2241_vm13, %v2486_v11, %v2482_v7 }
 0x27d   :  { %v2492_v17 = vsel %vm2248_vm14, %v2491_v5, %v2487_v54  ;;  %v2024_v18 = vpop.xlane.xlu0 %2023 }
 0x27e   :  { %v2497_v29 = vsel %vm2255_vm15, %v2496_v36, %v2492_v17  ;;  %v2817_v57 = vrot.slane %v2024_v18, %v4491_v4 }
 0x27f   :  { %v2502_v22 = vsel %vm2262_vm0, %v2501_v37, %v2497_v29 }
 0x280   :  { %v2507_v24 = vsel %vm2269_vm1, %v2506_v40, %v2502_v22 }
 0x281   :  { %v2022_v55 = vpop.xlane.xlu0 %2021  ;;  %v2829_v32 = vsel %vm2828_vm3, %v2507_v24, %v4754_v25  ;;  %v2822_v25 = vrot.slane %v2026_v2, %v4531_v27 }
 0x282   :  { %v2812_v15 = vrot.slane %v2022_v55, %v4456_v26  ;;  %v2831_v47 = vsel %vm2830_vm4, %v2586_v53, %v2829_v32 }
 0x283   :  { %v2833_v42 = vsel %vm2832_vm5, %v4669_v45, %v2831_v47 }
 0x284   :  { %v2813_v59 = vsel %vm2255_vm15, %v2812_v15, %v2808_v43  ;;  %v2835_v56 = vsel %vm2834_vm6, %v2744_v38, %v2833_v42 }
 0x285   :  { %v2818_v30 = vsel %vm2262_vm0, %v2817_v57, %v2813_v59 }
 0x286   :  { %v2823_v26 = vsel %vm2269_vm1, %v2822_v25, %v2818_v30 }
 0x287   :  { %v2032_v19 = vpop.permute.xlu0 %2031  ;;  %v2837_v51 = vsel %vm2836_vm7, %v2823_v26, %v2835_v56 }
 0x288   :  { %vm2033_vm8 = vcmp.lt.s32.totalorder %v4174_v41, %v2032_v19 }
 0x289   :  { %v2839_v9 = vsel %vm2033_vm8, %v2837_v51, -1e+30 }
 0x28a   :  { %2840 = vmax.xlane.f32.xlu1 %v2839_v9 }
 0x313   :  { %v2841_v39 = vpop.xlane.xlu1 %2840 }
 0x314   :  { %v2842_v4 = vsub.f32 %v2839_v9, %v2841_v39 }
 0x316   :  { %v2843_v14 = vmul.f32 1.442695, %v2842_v4 }
 0x318   :  { %3535 = vpow2.f32 %v2843_v14 }
 0x325   :  { %v3536_v45 = vpop.eup %3535 }
 0x326   :  { %2845 = vadd.xlane.f32.xlu1 %v3536_v45 }
 0x3af   :  { %v2846_v58 = vpop.xlane.xlu1 %2845 }
 0x3b0   :  { %3537 = vrcp.f32 %v2846_v58 }
 0x3bd   :  { %v3538_v27 = vpop.eup %3537 }
 0x3be   :  { %v2848_v35 = vmul.f32 %v3538_v27, %v3536_v45 }
 0x3c0   :  { %2849 = vst [vmem:[#allocation2] sm:$0xff] %v2848_v35 }
 0x3c1   :  { %3551 = shalt.err (!%p3548_p4)
}
 0x3c2   :  { %2859 = dma.vmem_to_hbm [thread:$0]  %s2857_s11, 128, %s4848_s7, [#allocation3]  }
 0x3c3   :  { %3560 = dma.done.wait [#allocation3], 128  }
 0x3c4   :  { %3561 = vsyncadd [#allocation3], 4294967168 }
 0x3c5   :  { %2863 = vsyncpa [#allocation3], 1 }

</bundles_post_ra>
